<compile_context>
chip_gen: v5e
topology: v5e:2x2
jax: 0.10.0
libtpu: 0.0.40
codegen_flags: <defaults>
</compile_context>

<pallas_src>
import functools

import jax
import jax.numpy as jnp
import numpy as np
from jax.experimental import pallas as pl
from jax.experimental.pallas import tpu as pltpu  # noqa: F401


def _round_up(x, m):
    return ((x + m - 1) // m) * m


# ----------------------------------------------------------------------------
# Fused Pallas kernel (single invocation, no grid, everything in VMEM)
# ----------------------------------------------------------------------------
def _fused_ien_kernel(idx_ref, verb_ref, table_ref, pool_ref,
                      wh_ref, w2h_ref, w128_ref,
                      logits_ref, rel_ref, *, ent_rows):
    f32 = jnp.float32
    T_pad = idx_ref.shape[0]
    V_pad, D_pad = table_ref.shape
    H = wh_ref.shape[1]
    H2 = w2h_ref.shape[1]
    R_all = pool_ref.shape[0] // 2          # stacked entity + location rows
    misc = D_pad                            # misc rows start in the 2H slab
    rnn_top = D_pad + 8                     # rnn_w rows multiplying the mean part
    rnn_bot = rnn_top + H2                  # rnn_w rows multiplying the verb part

    def row2h(r):                           # (1, 2H) single-row view of 2H slab
        return w2h_ref[r:r + 1, :]

    def rowh(r):                            # (1, H) bias/gain/beta row of H slab
        return wh_ref[3 * H2 + r: 3 * H2 + r + 1, :]

    def ln(h, g, b):                        # LayerNorm(H), eps = 1e-5
        mu = jnp.mean(h, axis=-1, keepdims=True)
        var = jnp.mean((h - mu) ** 2, axis=-1, keepdims=True)
        return (h - mu) * jax.lax.rsqrt(var + 1e-5) * g + b

    # ---- word-level encoder ------------------------------------------------
    # TODO(synk): LSTMEncoder source unavailable -> per-token Linear+tanh stand-in.
    # Embedding gather fused as an exact one-hot matmul (small vocab fits VMEM;
    # for large vocabs keep the gather outside or use a DMA gather instead).
    onehot = (jax.lax.broadcasted_iota(jnp.int32, (T_pad, V_pad), 1)
              == idx_ref[...]).astype(f32)                                # (T, V)
    emb = jnp.dot(onehot, table_ref[...], preferred_element_type=f32)     # (T, D)
    w_enc = jnp.tanh(
        jnp.dot(emb, w2h_ref[0:D_pad, :], preferred_element_type=f32)
        + verb_ref[...] * row2h(misc + 0)          # verb feature column, folded in
        + row2h(misc + 1))                                                # (T, 2H)

    # ---- algebraic removal of the 4H concat --------------------------------
    # concat([mean_pool, verb_pool]) @ rnn_w == mean_pool @ A + verb_pool @ B
    A = jnp.dot(w_enc, w2h_ref[rnn_top:rnn_top + H2, :],
                preferred_element_type=f32)                               # (T, 2H)
    B = jnp.dot(w_enc, w2h_ref[rnn_bot:rnn_bot + H2, :],
                preferred_element_type=f32)                               # (T, 2H)

    # ---- span/verb mean pooling + state-location RNN stand-in --------------
    # Entity and location rows stacked into one pass; split by sublane rows.
    # TODO(synk): CustomRNN/StateLocationGraphGRUCell source unavailable ->
    # per-position Linear+tanh stand-in.
    pre = (jnp.dot(pool_ref[0:R_all, :], A, preferred_element_type=f32)
           + jnp.dot(pool_ref[R_all:2 * R_all, :], B, preferred_element_type=f32))
    enc = jnp.tanh(pre + row2h(misc + 2))                                 # (R_all, 2H)
    ent_enc = enc[0:ent_rows, :]                                          # (Re, 2H)
    loc_enc = enc[ent_rows:, :]                                           # (128, 2H)

    # ---- MLP heads (Dropout = identity in eval) -----------------------------
    # Three clean H-wide matmuls (no 32-lane slices of a fused result).
    sm = jnp.maximum(
        ln(jnp.dot(ent_enc, wh_ref[0:H2, :], preferred_element_type=f32) + rowh(0),
           rowh(1), rowh(2)), 0.0)                                        # state_mlp[1:4]
    ent_feat = jnp.maximum(
        ln(jnp.dot(ent_enc, wh_ref[H2:2 * H2, :], preferred_element_type=f32) + rowh(3),
           rowh(4), rowh(5)), 0.0)                                        # location_mlp_1
    loc_feat = jnp.maximum(
        ln(jnp.dot(loc_enc, wh_ref[2 * H2:3 * H2, :], preferred_element_type=f32) + rowh(6),
           rowh(7), rowh(8)), 0.0)                                        # location_mlp_2

    # ---- state logits: lane-padded sm_w2 -> full 128-lane unmasked store ----
    logits_ref[...] = (jnp.dot(sm, w128_ref[0:H, :], preferred_element_type=f32)
                       + w128_ref[H:H + 1, :])

    # ---- relevance: one NT contraction, 128 output lanes, unmasked store ----
    # (location rows padded to 128; garbage columns are sliced off by the wrapper)
    rel_ref[...] = jax.lax.dot_general(
        ent_feat, loc_feat, (((1,), (1,)), ((), ())), preferred_element_type=f32)


# ----------------------------------------------------------------------------
# One-time host-side parameter packing (a few lane-width-grouped slabs)
# ----------------------------------------------------------------------------
def pack_params(params):
    H = params["sm_w1"].shape[1]
    H2 = 2 * H
    D = params["embedding"].shape[1]
    D_pad = _round_up(D, 8)
    V = params["embedding"].shape[0]
    V_pad = _round_up(V, 128)                 # one-hot gather lane width
    L = params["sm_w2"].shape[1]
    L_pad = _round_up(max(L, 128), 128)

    def g(name):
        return np.asarray(params[name], np.float32)

    table = np.zeros((V_pad, D_pad), np.float32)
    table[:V, :D] = g("embedding")            # row 0 == padding_idx == zeros

    # 2H-lane slab: [word_enc_w(emb rows) ; misc rows ; rnn_w top ; rnn_w bottom]
    w2h = np.zeros((D_pad + 8 + 2 * H2, H2), np.float32)
    wwe = g("word_enc_w")                     # (D+1, 2H)
    w2h[:D] = wwe[:D]
    w2h[D_pad + 0] = wwe[D]                   # verb-feature weight row
    w2h[D_pad + 1] = g("word_enc_b")[0]
    w2h[D_pad + 2] = g("rnn_b")[0]
    w2h[D_pad + 8:D_pad + 8 + H2] = g("rnn_w")[:H2]   # multiplies the mean-pool part
    w2h[D_pad + 8 + H2:] = g("rnn_w")[H2:]            # multiplies the verb-pool part

    # H-lane slab: [sm_w1 ; l1_w ; l2_w ; bias/gain/beta rows]
    wh = np.zeros((3 * H2 + 16, H), np.float32)
    wh[0:H2] = g("sm_w1")
    wh[H2:2 * H2] = g("l1_w")
    wh[2 * H2:3 * H2] = g("l2_w")
    for k, name in enumerate(("sm_b1", "sm_g", "sm_beta",
                              "l1_b", "l1_g", "l1_beta",
                              "l2_b", "l2_g", "l2_beta")):
        wh[3 * H2 + k] = g(name)[0]

    # 128-lane slab: [sm_w2 lane-padded ; sm_b2 row] -> unmasked logits store
    w128 = np.zeros((_round_up(H + 1, 8), L_pad), np.float32)
    w128[:H, :L] = g("sm_w2")
    w128[H, :L] = g("sm_b2")[0]

    return dict(table=jnp.asarray(table), w2h=jnp.asarray(w2h),
                wh=jnp.asarray(wh), w128=jnp.asarray(w128),
                hidden_dim=H, label_size=L, label_pad=L_pad)


# ----------------------------------------------------------------------------
# Trace-time-constant pooling matrices (replace python span-pooling loops)
# ----------------------------------------------------------------------------
def build_pooling(T_pad, verbs_idxs_sents, entity_idxs_sents, entity_to_idx,
                  location_candidate_idxs_sents, location_candidate_to_idx):
    S = len(verbs_idxs_sents)
    Sp2 = S + 2
    n_ent = len(entity_to_idx)
    n_loc = len(location_candidate_to_idx)
    Re_pad = _round_up(Sp2 * n_ent, 8)
    # Location rows padded to a multiple of 128 so the in-kernel relevance
    # contraction directly produces a lane-dense output (unmasked stores).
    Rl_pad = max(128, _round_up(Sp2 * n_loc, 128))
    R_all = Re_pad + Rl_pad

    # Per-(padded)-sentence verb mean-pooling rows; row 0 = start encoding = zeros.
    V_rows = np.zeros((Sp2, T_pad), np.float32)
    for k, idxs in enumerate(verbs_idxs_sents):
        if idxs:
            for t in idxs:
                V_rows[k + 1, t] += 1.0 / len(idxs)

    # One stacked constant: rows [0:R_all] = mean-pooling, rows [R_all:2R_all] = verb.
    pool = np.zeros((2 * R_all, T_pad), np.float32)

    def fill(idxs_sents, name_to_idx, M, base):
        for name, per_sent in idxs_sents.items():
            m = name_to_idx[name]
            for i, span in enumerate(per_sent):
                if not span:
                    continue                 # empty span -> zero 4H input (reference)
                row = (i + 1) * M + m        # padded rows 0 / Sp2-1 stay zero (start/end)
                lo, hi = int(span[0]), int(span[1])
                pool[base + row, lo:hi + 1] = 1.0 / (hi - lo + 1)
                # NB: the reference concatenates verbs_sents[i] -- the *previous*
                # padded row (zeros for i == 0); that indexing is reproduced exactly.
                pool[R_all + base + row, :] = V_rows[i, :]

    fill(entity_idxs_sents, entity_to_idx, n_ent, 0)
    fill(location_candidate_idxs_sents, location_candidate_to_idx, n_loc, Re_pad)
    return jnp.asarray(pool), Sp2, n_ent, n_loc, Re_pad, Rl_pad


# ----------------------------------------------------------------------------
# Deterministic parameter construction
# ----------------------------------------------------------------------------
def _init_linear(key, fan_in, fan_out):
    kw, kb = jax.random.split(key)
    bound = 1.0 / (fan_in ** 0.5)
    w = jax.random.uniform(kw, (fan_in, fan_out), jnp.float32, -bound, bound)
    b = jax.random.uniform(kb, (1, fan_out), jnp.float32, -bound, bound)
    return w, b


def make_params(key, vocab_size, embedding_dim, hidden_dim, label_size):
    ks = jax.random.split(key, 8)
    H = hidden_dim
    params = {}
    params["embedding"] = (
        jax.random.normal(ks[0], (vocab_size, embedding_dim), jnp.float32)
        .at[0].set(0.0)  # padding_idx=0
    )
    # TODO(synk): LSTMEncoder source unavailable -> per-token linear+tanh stand-in (emb_dim+1 -> 2H)
    params["word_enc_w"], params["word_enc_b"] = _init_linear(ks[1], embedding_dim + 1, 2 * H)
    # TODO(synk): CustomRNN/StateLocationGraphGRUCell source unavailable -> per-position linear+tanh stand-in (4H -> 2H)
    params["rnn_w"], params["rnn_b"] = _init_linear(ks[2], 4 * H, 2 * H)
    # state_mlp: Linear(2H,H) + LayerNorm(H) + ReLU + Linear(H,label_size)
    params["sm_w1"], params["sm_b1"] = _init_linear(ks[3], 2 * H, H)
    params["sm_g"] = jnp.ones((1, H), jnp.float32)
    params["sm_beta"] = jnp.zeros((1, H), jnp.float32)
    params["sm_w2"], params["sm_b2"] = _init_linear(ks[4], H, label_size)
    # location_mlp_1 / location_mlp_2: Linear(2H,H) + LayerNorm(H) + ReLU
    params["l1_w"], params["l1_b"] = _init_linear(ks[5], 2 * H, H)
    params["l1_g"] = jnp.ones((1, H), jnp.float32)
    params["l1_beta"] = jnp.zeros((1, H), jnp.float32)
    params["l2_w"], params["l2_b"] = _init_linear(ks[6], 2 * H, H)
    params["l2_g"] = jnp.ones((1, H), jnp.float32)
    params["l2_beta"] = jnp.zeros((1, H), jnp.float32)
    return params


# ----------------------------------------------------------------------------
# IENModel forward (eval mode: all Dropout layers are identity)
# ----------------------------------------------------------------------------
def ien_forward(packed, words_idxs, verbs, sents_length,
                verbs_idxs_sents,
                entity_idxs_sents, entity_to_idx,
                location_candidate_idxs_sents, location_candidate_to_idx):
    label_size = packed["label_size"]
    T = int(words_idxs.shape[0])
    T_pad = _round_up(T, 8)

    # pooling constants (host/numpy; trace-time constants)
    pool, Sp2, n_ent, n_loc, Re_pad, Rl_pad = build_pooling(
        T_pad, verbs_idxs_sents, entity_idxs_sents, entity_to_idx,
        location_candidate_idxs_sents, location_candidate_to_idx)

    # token features (padded token rows: idx 0 -> zero embedding row, verb 0)
    idx_np = np.zeros((T_pad, 1), np.int32)
    idx_np[:T, 0] = np.asarray(words_idxs, np.int32)
    verb_np = np.zeros((T_pad, 1), np.float32)
    verb_np[:T, 0] = np.asarray(verbs, np.float32)

    kernel = functools.partial(_fused_ien_kernel, ent_rows=Re_pad)

    @jax.jit
    def run(idx_col, verb_col, pool_c, table, wh, w2h, w128):
        logits128, rel128 = pl.pallas_call(
            kernel,
            out_shape=(jax.ShapeDtypeStruct((Re_pad, packed["label_pad"]), jnp.float32),
                       jax.ShapeDtypeStruct((Re_pad, Rl_pad), jnp.float32)),
        )(idx_col, verb_col, table, pool_c, wh, w2h, w128)

        # Rows >= Sp2*n_ent and lanes >= Sp2*n_loc contain stand-in garbage from
        # zero-padded rows; they are sliced off here (never reduce over raw slabs).
        states_logit = logits128[:Sp2 * n_ent, :label_size].reshape(1, Sp2, n_ent, label_size)
        rel4 = rel128[:Sp2 * n_ent, :Sp2 * n_loc].reshape(Sp2, n_ent, Sp2, n_loc)
        # block-diagonal (per-sentence) relevance via reshape + diagonal extraction
        relevence_mat = jnp.moveaxis(jnp.diagonal(rel4, axis1=0, axis2=2), -1, 0)

        entity_states_logit = {e: states_logit[:, :, i, :]
                               for e, i in entity_to_idx.items()}
        # NB: same assumption as the reference: sents_length[0] == S + 2
        entity_locations_logit = {e: relevence_mat[:, i, :].reshape(1, sents_length[0], -1)
                                  for e, i in entity_to_idx.items()}
        return entity_states_logit, entity_locations_logit

    return run(jnp.asarray(idx_np), jnp.asarray(verb_np), pool,
               packed["table"], packed["wh"], packed["w2h"], packed["w128"])


# ----------------------------------------------------------------------------
# main
# ----------------------------------------------------------------------------
if __name__ == "__main__":
    H = 32            # hidden_dim
    D = 32            # embedding_dim
    VOCAB = 50
    LABELS = 6
    T = 24            # total number of words
    S = 4             # number of sentences

    key = jax.random.PRNGKey(0)
    k_param, k_idx, k_verb = jax.random.split(key, 3)

    params = make_params(k_param, VOCAB, D, H, LABELS)
    packed = pack_params(params)          # one-time host-side packing

    words_idxs = jax.random.randint(k_idx, (T,), 1, VOCAB)
    verbs = (jax.random.uniform(k_verb, (T,)) > 0.8).astype(jnp.float32)
    sents_length = [S + 2]  # padded sentence count (start/end rows included)

    verbs_idxs_sents = [[1, 2], [], [10], [15, 16, 17]]
    entity_to_idx = {"e0": 0, "e1": 1, "e2": 2}
    entity_idxs_sents = {
        "e0": [[0, 2], [], [12, 13], []],
        "e1": [[], [7, 8], [], [20, 21]],
        "e2": [[3, 3], [], [], [22, 23]],
    }
    location_candidate_to_idx = {"l0": 0, "l1": 1}
    location_candidate_idxs_sents = {
        "l0": [[4, 5], [], [14, 14], []],
        "l1": [[], [9, 9], [], [18, 19]],
    }

    states_logit, locations_logit = ien_forward(
        packed,
        words_idxs, verbs, sents_length,
        verbs_idxs_sents,
        entity_idxs_sents, entity_to_idx,
        location_candidate_idxs_sents, location_candidate_to_idx,
    )

    for v in states_logit.values():
        jax.block_until_ready(v)
    for v in locations_logit.values():
        jax.block_until_ready(v)

    # sanity on shapes
    assert states_logit["e0"].shape == (1, S + 2, LABELS)
    assert locations_logit["e0"].shape == (1, S + 2, len(location_candidate_to_idx))

    print("KERNEL_OK")
</pallas_src>

<mosaic_0001>
module attributes {stable_mosaic.version = 11 : i64} {
  func.func @_fused_ien_kernel(%arg0: memref<24x1xi32, #tpu.memory_space<vmem>>, %arg1: memref<24x1xf32, #tpu.memory_space<vmem>>, %arg2: memref<128x32xf32, #tpu.memory_space<vmem>>, %arg3: memref<304x24xf32, #tpu.memory_space<vmem>>, %arg4: memref<208x32xf32, #tpu.memory_space<vmem>>, %arg5: memref<168x64xf32, #tpu.memory_space<vmem>>, %arg6: memref<40x128xf32, #tpu.memory_space<vmem>>, %arg7: memref<24x128xf32, #tpu.memory_space<vmem>>, %arg8: memref<24x128xf32, #tpu.memory_space<vmem>>) attributes {dimension_semantics = [], scalar_prefetch = 0 : i64, scratch_operands = 0 : i64, tpu.core_type = #tpu.core_type<tc>} {
    %0 = tpu.iota {dimensions = array<i32: 1>} : vector<24x128xi32>
    %c0 = arith.constant 0 : index
    %c0_0 = arith.constant 0 : index
    %1 = vector.load %arg0[%c0, %c0_0] : memref<24x1xi32, #tpu.memory_space<vmem>>, vector<24x1xi32>
    %2 = vector.broadcast %1 : vector<24x1xi32> to vector<24x128xi32>
    %3 = arith.cmpi eq, %0, %2 : vector<24x128xi32>
    %4 = arith.extui %3 : vector<24x128xi1> to vector<24x128xi32>
    %5 = arith.sitofp %4 : vector<24x128xi32> to vector<24x128xf32>
    %c0_1 = arith.constant 0 : index
    %c0_2 = arith.constant 0 : index
    %6 = vector.load %arg2[%c0_1, %c0_2] : memref<128x32xf32, #tpu.memory_space<vmem>>, vector<128x32xf32>
    %cst = arith.constant dense<0.000000e+00> : vector<24x32xf32>
    %7 = tpu.matmul %5, %6, %cst {dimension_numbers = #tpu.dot_dimension_numbers<[1], [0], [0], [1], [0, 0, 1, 1], [], []>} : vector<24x128xf32>, vector<128x32xf32>, vector<24x32xf32> -> vector<24x32xf32>
    %c0_3 = arith.constant 0 : index
    %c0_4 = arith.constant 0 : index
    %8 = vector.load %arg5[%c0_3, %c0_4] : memref<168x64xf32, #tpu.memory_space<vmem>>, vector<32x64xf32>
    %cst_5 = arith.constant dense<0.000000e+00> : vector<24x64xf32>
    %9 = tpu.matmul %7, %8, %cst_5 {dimension_numbers = #tpu.dot_dimension_numbers<[1], [0], [0], [1], [0, 0, 1, 1], [], []>} : vector<24x32xf32>, vector<32x64xf32>, vector<24x64xf32> -> vector<24x64xf32>
    %c0_6 = arith.constant 0 : index
    %c0_7 = arith.constant 0 : index
    %10 = vector.load %arg1[%c0_6, %c0_7] : memref<24x1xf32, #tpu.memory_space<vmem>>, vector<24x1xf32>
    %c32 = arith.constant 32 : index
    %c0_8 = arith.constant 0 : index
    %11 = vector.load %arg5[%c32, %c0_8] : memref<168x64xf32, #tpu.memory_space<vmem>>, vector<1x64xf32>
    %12 = vector.broadcast %10 : vector<24x1xf32> to vector<24x64xf32>
    %13 = vector.broadcast %11 : vector<1x64xf32> to vector<24x64xf32>
    %14 = arith.mulf %12, %13 : vector<24x64xf32>
    %15 = arith.addf %9, %14 : vector<24x64xf32>
    %c33 = arith.constant 33 : index
    %c0_9 = arith.constant 0 : index
    %16 = vector.load %arg5[%c33, %c0_9] : memref<168x64xf32, #tpu.memory_space<vmem>>, vector<1x64xf32>
    %17 = vector.broadcast %16 : vector<1x64xf32> to vector<24x64xf32>
    %18 = arith.addf %15, %17 : vector<24x64xf32>
    %19 = math.tanh %18 : vector<24x64xf32>
    %c40 = arith.constant 40 : index
    %c0_10 = arith.constant 0 : index
    %20 = vector.load %arg5[%c40, %c0_10] : memref<168x64xf32, #tpu.memory_space<vmem>>, vector<64x64xf32>
    %cst_11 = arith.constant dense<0.000000e+00> : vector<24x64xf32>
    %21 = tpu.matmul %19, %20, %cst_11 {dimension_numbers = #tpu.dot_dimension_numbers<[1], [0], [0], [1], [0, 0, 1, 1], [], []>} : vector<24x64xf32>, vector<64x64xf32>, vector<24x64xf32> -> vector<24x64xf32>
    %c104 = arith.constant 104 : index
    %c0_12 = arith.constant 0 : index
    %22 = vector.load %arg5[%c104, %c0_12] : memref<168x64xf32, #tpu.memory_space<vmem>>, vector<64x64xf32>
    %cst_13 = arith.constant dense<0.000000e+00> : vector<24x64xf32>
    %23 = tpu.matmul %19, %22, %cst_13 {dimension_numbers = #tpu.dot_dimension_numbers<[1], [0], [0], [1], [0, 0, 1, 1], [], []>} : vector<24x64xf32>, vector<64x64xf32>, vector<24x64xf32> -> vector<24x64xf32>
    %c0_14 = arith.constant 0 : index
    %c0_15 = arith.constant 0 : index
    %24 = vector.load %arg3[%c0_14, %c0_15] : memref<304x24xf32, #tpu.memory_space<vmem>>, vector<152x24xf32>
    %cst_16 = arith.constant dense<0.000000e+00> : vector<152x64xf32>
    %25 = tpu.matmul %24, %21, %cst_16 {dimension_numbers = #tpu.dot_dimension_numbers<[1], [0], [0], [1], [0, 0, 1, 1], [], []>} : vector<152x24xf32>, vector<24x64xf32>, vector<152x64xf32> -> vector<152x64xf32>
    %c152 = arith.constant 152 : index
    %c0_17 = arith.constant 0 : index
    %26 = vector.load %arg3[%c152, %c0_17] : memref<304x24xf32, #tpu.memory_space<vmem>>, vector<152x24xf32>
    %cst_18 = arith.constant dense<0.000000e+00> : vector<152x64xf32>
    %27 = tpu.matmul %26, %23, %cst_18 {dimension_numbers = #tpu.dot_dimension_numbers<[1], [0], [0], [1], [0, 0, 1, 1], [], []>} : vector<152x24xf32>, vector<24x64xf32>, vector<152x64xf32> -> vector<152x64xf32>
    %28 = arith.addf %25, %27 : vector<152x64xf32>
    %c34 = arith.constant 34 : index
    %c0_19 = arith.constant 0 : index
    %29 = vector.load %arg5[%c34, %c0_19] : memref<168x64xf32, #tpu.memory_space<vmem>>, vector<1x64xf32>
    %30 = vector.broadcast %29 : vector<1x64xf32> to vector<152x64xf32>
    %31 = arith.addf %28, %30 : vector<152x64xf32>
    %32 = math.tanh %31 : vector<152x64xf32>
    %33 = vector.extract_strided_slice %32 {offsets = [0, 0], sizes = [24, 64], strides = [1, 1]} : vector<152x64xf32> to vector<24x64xf32>
    %34 = vector.extract_strided_slice %32 {offsets = [24, 0], sizes = [128, 64], strides = [1, 1]} : vector<152x64xf32> to vector<128x64xf32>
    %c0_20 = arith.constant 0 : index
    %c0_21 = arith.constant 0 : index
    %35 = vector.load %arg4[%c0_20, %c0_21] : memref<208x32xf32, #tpu.memory_space<vmem>>, vector<64x32xf32>
    %cst_22 = arith.constant dense<0.000000e+00> : vector<24x32xf32>
    %36 = tpu.matmul %33, %35, %cst_22 {dimension_numbers = #tpu.dot_dimension_numbers<[1], [0], [0], [1], [0, 0, 1, 1], [], []>} : vector<24x64xf32>, vector<64x32xf32>, vector<24x32xf32> -> vector<24x32xf32>
    %c192 = arith.constant 192 : index
    %c0_23 = arith.constant 0 : index
    %37 = vector.load %arg4[%c192, %c0_23] : memref<208x32xf32, #tpu.memory_space<vmem>>, vector<1x32xf32>
    %38 = vector.broadcast %37 : vector<1x32xf32> to vector<24x32xf32>
    %39 = arith.addf %36, %38 : vector<24x32xf32>
    %c193 = arith.constant 193 : index
    %c0_24 = arith.constant 0 : index
    %40 = vector.load %arg4[%c193, %c0_24] : memref<208x32xf32, #tpu.memory_space<vmem>>, vector<1x32xf32>
    %c194 = arith.constant 194 : index
    %c0_25 = arith.constant 0 : index
    %41 = vector.load %arg4[%c194, %c0_25] : memref<208x32xf32, #tpu.memory_space<vmem>>, vector<1x32xf32>
    %cst_26 = arith.constant dense<0.000000e+00> : vector<24xf32>
    %42 = vector.multi_reduction <add>, %39, %cst_26 [1] : vector<24x32xf32> to vector<24xf32>
    %43 = vector.shape_cast %42 : vector<24xf32> to vector<24x1xf32>
    %cst_27 = arith.constant 3.200000e+01 : f32
    %44 = vector.broadcast %cst_27 : f32 to vector<24x1xf32>
    %45 = arith.divf %43, %44 : vector<24x1xf32>
    %46 = vector.broadcast %45 : vector<24x1xf32> to vector<24x32xf32>
    %47 = arith.subf %39, %46 : vector<24x32xf32>
    %48 = arith.mulf %47, %47 : vector<24x32xf32>
    %cst_28 = arith.constant dense<0.000000e+00> : vector<24xf32>
    %49 = vector.multi_reduction <add>, %48, %cst_28 [1] : vector<24x32xf32> to vector<24xf32>
    %50 = vector.shape_cast %49 : vector<24xf32> to vector<24x1xf32>
    %cst_29 = arith.constant 3.200000e+01 : f32
    %51 = vector.broadcast %cst_29 : f32 to vector<24x1xf32>
    %52 = arith.divf %50, %51 : vector<24x1xf32>
    %53 = vector.broadcast %45 : vector<24x1xf32> to vector<24x32xf32>
    %54 = arith.subf %39, %53 : vector<24x32xf32>
    %cst_30 = arith.constant 9.99999974E-6 : f32
    %55 = vector.broadcast %cst_30 : f32 to vector<24x1xf32>
    %56 = arith.addf %52, %55 : vector<24x1xf32>
    %57 = math.rsqrt %56 : vector<24x1xf32>
    %58 = vector.broadcast %57 : vector<24x1xf32> to vector<24x32xf32>
    %59 = arith.mulf %54, %58 : vector<24x32xf32>
    %60 = vector.broadcast %40 : vector<1x32xf32> to vector<24x32xf32>
    %61 = arith.mulf %59, %60 : vector<24x32xf32>
    %62 = vector.broadcast %41 : vector<1x32xf32> to vector<24x32xf32>
    %63 = arith.addf %61, %62 : vector<24x32xf32>
    %cst_31 = arith.constant 0.000000e+00 : f32
    %64 = vector.broadcast %cst_31 : f32 to vector<24x32xf32>
    %65 = arith.maximumf %63, %64 : vector<24x32xf32>
    %c64 = arith.constant 64 : index
    %c0_32 = arith.constant 0 : index
    %66 = vector.load %arg4[%c64, %c0_32] : memref<208x32xf32, #tpu.memory_space<vmem>>, vector<64x32xf32>
    %cst_33 = arith.constant dense<0.000000e+00> : vector<24x32xf32>
    %67 = tpu.matmul %33, %66, %cst_33 {dimension_numbers = #tpu.dot_dimension_numbers<[1], [0], [0], [1], [0, 0, 1, 1], [], []>} : vector<24x64xf32>, vector<64x32xf32>, vector<24x32xf32> -> vector<24x32xf32>
    %c195 = arith.constant 195 : index
    %c0_34 = arith.constant 0 : index
    %68 = vector.load %arg4[%c195, %c0_34] : memref<208x32xf32, #tpu.memory_space<vmem>>, vector<1x32xf32>
    %69 = vector.broadcast %68 : vector<1x32xf32> to vector<24x32xf32>
    %70 = arith.addf %67, %69 : vector<24x32xf32>
    %c196 = arith.constant 196 : index
    %c0_35 = arith.constant 0 : index
    %71 = vector.load %arg4[%c196, %c0_35] : memref<208x32xf32, #tpu.memory_space<vmem>>, vector<1x32xf32>
    %c197 = arith.constant 197 : index
    %c0_36 = arith.constant 0 : index
    %72 = vector.load %arg4[%c197, %c0_36] : memref<208x32xf32, #tpu.memory_space<vmem>>, vector<1x32xf32>
    %cst_37 = arith.constant dense<0.000000e+00> : vector<24xf32>
    %73 = vector.multi_reduction <add>, %70, %cst_37 [1] : vector<24x32xf32> to vector<24xf32>
    %74 = vector.shape_cast %73 : vector<24xf32> to vector<24x1xf32>
    %cst_38 = arith.constant 3.200000e+01 : f32
    %75 = vector.broadcast %cst_38 : f32 to vector<24x1xf32>
    %76 = arith.divf %74, %75 : vector<24x1xf32>
    %77 = vector.broadcast %76 : vector<24x1xf32> to vector<24x32xf32>
    %78 = arith.subf %70, %77 : vector<24x32xf32>
    %79 = arith.mulf %78, %78 : vector<24x32xf32>
    %cst_39 = arith.constant dense<0.000000e+00> : vector<24xf32>
    %80 = vector.multi_reduction <add>, %79, %cst_39 [1] : vector<24x32xf32> to vector<24xf32>
    %81 = vector.shape_cast %80 : vector<24xf32> to vector<24x1xf32>
    %cst_40 = arith.constant 3.200000e+01 : f32
    %82 = vector.broadcast %cst_40 : f32 to vector<24x1xf32>
    %83 = arith.divf %81, %82 : vector<24x1xf32>
    %84 = vector.broadcast %76 : vector<24x1xf32> to vector<24x32xf32>
    %85 = arith.subf %70, %84 : vector<24x32xf32>
    %cst_41 = arith.constant 9.99999974E-6 : f32
    %86 = vector.broadcast %cst_41 : f32 to vector<24x1xf32>
    %87 = arith.addf %83, %86 : vector<24x1xf32>
    %88 = math.rsqrt %87 : vector<24x1xf32>
    %89 = vector.broadcast %88 : vector<24x1xf32> to vector<24x32xf32>
    %90 = arith.mulf %85, %89 : vector<24x32xf32>
    %91 = vector.broadcast %71 : vector<1x32xf32> to vector<24x32xf32>
    %92 = arith.mulf %90, %91 : vector<24x32xf32>
    %93 = vector.broadcast %72 : vector<1x32xf32> to vector<24x32xf32>
    %94 = arith.addf %92, %93 : vector<24x32xf32>
    %cst_42 = arith.constant 0.000000e+00 : f32
    %95 = vector.broadcast %cst_42 : f32 to vector<24x32xf32>
    %96 = arith.maximumf %94, %95 : vector<24x32xf32>
    %c128 = arith.constant 128 : index
    %c0_43 = arith.constant 0 : index
    %97 = vector.load %arg4[%c128, %c0_43] : memref<208x32xf32, #tpu.memory_space<vmem>>, vector<64x32xf32>
    %cst_44 = arith.constant dense<0.000000e+00> : vector<128x32xf32>
    %98 = tpu.matmul %34, %97, %cst_44 {dimension_numbers = #tpu.dot_dimension_numbers<[1], [0], [0], [1], [0, 0, 1, 1], [], []>} : vector<128x64xf32>, vector<64x32xf32>, vector<128x32xf32> -> vector<128x32xf32>
    %c198 = arith.constant 198 : index
    %c0_45 = arith.constant 0 : index
    %99 = vector.load %arg4[%c198, %c0_45] : memref<208x32xf32, #tpu.memory_space<vmem>>, vector<1x32xf32>
    %100 = vector.broadcast %99 : vector<1x32xf32> to vector<128x32xf32>
    %101 = arith.addf %98, %100 : vector<128x32xf32>
    %c199 = arith.constant 199 : index
    %c0_46 = arith.constant 0 : index
    %102 = vector.load %arg4[%c199, %c0_46] : memref<208x32xf32, #tpu.memory_space<vmem>>, vector<1x32xf32>
    %c200 = arith.constant 200 : index
    %c0_47 = arith.constant 0 : index
    %103 = vector.load %arg4[%c200, %c0_47] : memref<208x32xf32, #tpu.memory_space<vmem>>, vector<1x32xf32>
    %cst_48 = arith.constant dense<0.000000e+00> : vector<128xf32>
    %104 = vector.multi_reduction <add>, %101, %cst_48 [1] : vector<128x32xf32> to vector<128xf32>
    %105 = vector.shape_cast %104 : vector<128xf32> to vector<128x1xf32>
    %cst_49 = arith.constant 3.200000e+01 : f32
    %106 = vector.broadcast %cst_49 : f32 to vector<128x1xf32>
    %107 = arith.divf %105, %106 : vector<128x1xf32>
    %108 = vector.broadcast %107 : vector<128x1xf32> to vector<128x32xf32>
    %109 = arith.subf %101, %108 : vector<128x32xf32>
    %110 = arith.mulf %109, %109 : vector<128x32xf32>
    %cst_50 = arith.constant dense<0.000000e+00> : vector<128xf32>
    %111 = vector.multi_reduction <add>, %110, %cst_50 [1] : vector<128x32xf32> to vector<128xf32>
    %112 = vector.shape_cast %111 : vector<128xf32> to vector<128x1xf32>
    %cst_51 = arith.constant 3.200000e+01 : f32
    %113 = vector.broadcast %cst_51 : f32 to vector<128x1xf32>
    %114 = arith.divf %112, %113 : vector<128x1xf32>
    %115 = vector.broadcast %107 : vector<128x1xf32> to vector<128x32xf32>
    %116 = arith.subf %101, %115 : vector<128x32xf32>
    %cst_52 = arith.constant 9.99999974E-6 : f32
    %117 = vector.broadcast %cst_52 : f32 to vector<128x1xf32>
    %118 = arith.addf %114, %117 : vector<128x1xf32>
    %119 = math.rsqrt %118 : vector<128x1xf32>
    %120 = vector.broadcast %119 : vector<128x1xf32> to vector<128x32xf32>
    %121 = arith.mulf %116, %120 : vector<128x32xf32>
    %122 = vector.broadcast %102 : vector<1x32xf32> to vector<128x32xf32>
    %123 = arith.mulf %121, %122 : vector<128x32xf32>
    %124 = vector.broadcast %103 : vector<1x32xf32> to vector<128x32xf32>
    %125 = arith.addf %123, %124 : vector<128x32xf32>
    %cst_53 = arith.constant 0.000000e+00 : f32
    %126 = vector.broadcast %cst_53 : f32 to vector<128x32xf32>
    %127 = arith.maximumf %125, %126 : vector<128x32xf32>
    %c0_54 = arith.constant 0 : index
    %c0_55 = arith.constant 0 : index
    %128 = vector.load %arg6[%c0_54, %c0_55] : memref<40x128xf32, #tpu.memory_space<vmem>>, vector<32x128xf32>
    %cst_56 = arith.constant dense<0.000000e+00> : vector<24x128xf32>
    %129 = tpu.matmul %65, %128, %cst_56 {dimension_numbers = #tpu.dot_dimension_numbers<[1], [0], [0], [1], [0, 0, 1, 1], [], []>} : vector<24x32xf32>, vector<32x128xf32>, vector<24x128xf32> -> vector<24x128xf32>
    %c32_57 = arith.constant 32 : index
    %c0_58 = arith.constant 0 : index
    %130 = vector.load %arg6[%c32_57, %c0_58] : memref<40x128xf32, #tpu.memory_space<vmem>>, vector<1x128xf32>
    %131 = vector.broadcast %130 : vector<1x128xf32> to vector<24x128xf32>
    %132 = arith.addf %129, %131 : vector<24x128xf32>
    %c0_59 = arith.constant 0 : index
    %c0_60 = arith.constant 0 : index
    %133 = vector.load %arg7[%c0_59, %c0_60] : memref<24x128xf32, #tpu.memory_space<vmem>>, vector<24x128xf32>
    tpu.vector_store %arg7[%c0_59, %c0_60], %132 {strides = array<i32>} : memref<24x128xf32, #tpu.memory_space<vmem>>, vector<24x128xf32>,
    %cst_61 = arith.constant dense<0.000000e+00> : vector<24x128xf32>
    %134 = tpu.matmul %96, %127, %cst_61 {dimension_numbers = #tpu.dot_dimension_numbers<[1], [1], [0], [0], [0, 0, 1, 0], [], []>} : vector<24x32xf32>, vector<128x32xf32>, vector<24x128xf32> -> vector<24x128xf32>
    %c0_62 = arith.constant 0 : index
    %c0_63 = arith.constant 0 : index
    %135 = vector.load %arg8[%c0_62, %c0_63] : memref<24x128xf32, #tpu.memory_space<vmem>>, vector<24x128xf32>
    tpu.vector_store %arg8[%c0_62, %c0_63], %134 {strides = array<i32>} : memref<24x128xf32, #tpu.memory_space<vmem>>, vector<24x128xf32>,
    return
  }
}

</mosaic_0001>

<bundles_post_ra>
// kernel: run.1
= control target key start
LH: loop header
LB: loop body
LE: loop exit
PB: predicated region body
PF: predicated region fallthrough
CT: control target
= control target key end

     0   :  { %v1716_v0 = vmov 0   ;;  %v28_v24 = vlaneseq  ;;  %v1717_v27 = vmov 1.0   ;;  %vm120_vm3 = vcmask 261120   ;;  %s2888_s0 = inlined_call_operand.vmem [shape: s32[24,1], index: 0, kind: input, shape index: {}]   ;;  %s2889_s2 = inlined_call_operand.vmem [shape: f32[128,32], index: 2, kind: input, shape index: {}]   ;;  %s2890_s1 = inlined_call_operand.vmem [shape: f32[24,1], index: 1, kind: input, shape index: {}]   ;;  %s2891_s5 = inlined_call_operand.vmem [shape: f32[168,64], index: 5, kind: input, shape index: {}]   ;;  %s2892_s3 = inlined_call_operand.vmem [shape: f32[304,24], index: 3, kind: input, shape index: {}]   ;;  %s2893_s4 = inlined_call_operand.vmem [shape: f32[208,32], index: 4, kind: input, shape index: {}]   ;;  %s2894_s6 = inlined_call_operand.vmem [shape: f32[40,128], index: 6, kind: input, shape index: {}]   ;;  %s2895_s7 = inlined_call_operand.vmem [shape: f32[24,128], index: 7, kind: output, shape index: {0}]   ;;  %s2896_s8 = inlined_call_operand.vmem [shape: f32[24,128], index: 8, kind: output, shape index: {1}]  }
   0x1   :  { %1610 = vset.pattern.permute.xlu0 %v1716_v0  ;;  %v30_v1 = vld [vmem:[%s2888_s0] sm:$0xff]  ;;  %1611 = vset.pattern.permute.xlu1 %v1716_v0  ;;  %v32_v2 = vld [vmem:[%s2888_s0 + $0x10] sm:$0xff]  ;;  %v66_v3 = vld [vmem:[%s2889_s2 + $0x78] sm:$0xff]  ;;  %vm172_vm4 = vcmask 523264   ;;  %vm280_vm5 = vcmask 195584  }
   0x2   :  { %34 = vperm.xlu0 %1610, %v30_v1   ;;  %40 = vperm.xlu1 %1611, %v32_v2   ;;  %v65_v4 = vld [vmem:[%s2889_s2 + $0x70] sm:$0xff]  ;;  %v64_v5 = vld [vmem:[%s2889_s2 + $0x68] sm:$0xff]  ;;  %v63_v7 = vld [vmem:[%s2889_s2 + $0x60] sm:$0xff]  ;;  %v29_v25 = vand.u32 127, %v28_v24 }
   0x3   :  { %67 = vmatpush.msra.mxu0 %v66_v3  ;;  %1612 = vset.pattern.permute.xlu2 %v1716_v0  ;;  %v31_v6 = vld [vmem:[%s2888_s0 + $0x8] sm:$0xff]  ;;  %v97_v8 = vld [vmem:[%s2890_s1] sm:$0xff]  ;;  %v62_v9 = vld [vmem:[%s2889_s2 + $0x58] sm:$0xff] }
   0x4   :  { %v61_v10 = vld [vmem:[%s2889_s2 + $0x50] sm:$0xff]  ;;  %v60_v11 = vld [vmem:[%s2889_s2 + $0x48] sm:$0xff]  ;;  %v59_v12 = vld [vmem:[%s2889_s2 + $0x40] sm:$0xff] }
   0x5   :  { %68 = vmatpush.msra.mxu0 %v65_v4  ;;  %v58_v13 = vld [vmem:[%s2889_s2 + $0x38] sm:$0xff]  ;;  %v57_v14 = vld [vmem:[%s2889_s2 + $0x30] sm:$0xff]  ;;  %v56_v15 = vld [vmem:[%s2889_s2 + $0x28] sm:$0xff] }
   0x6   :  { %v55_v16 = vld [vmem:[%s2889_s2 + $0x20] sm:$0xff]  ;;  %v54_v17 = vld [vmem:[%s2889_s2 + $0x18] sm:$0xff]  ;;  %v53_v18 = vld [vmem:[%s2889_s2 + $0x10] sm:$0xff] }
   0x7   :  { %69 = vmatpush.msra.mxu0 %v64_v5  ;;  %v52_v19 = vld [vmem:[%s2889_s2 + $0x8] sm:$0xff]  ;;  %v51_v20 = vld [vmem:[%s2889_s2] sm:$0xff]  ;;  %v96_v21 = vld [vmem:[%s2891_s5 + $0x18] sm:$0xff] }
   0x8   :  { %v95_v22 = vld [vmem:[%s2891_s5 + $0x10] sm:$0xff]  ;;  %142 = vmatpush.msra.mxu1 %v96_v21  ;;  %v94_v23 = vld [vmem:[%s2891_s5 + $0x8] sm:$0xff]  ;;  %v93_v30 = vld [vmem:[%s2891_s5] sm:$0xff] }
   0x9   :  { %70 = vmatpush.msra.mxu0 %v63_v7  ;;  %v98_v31 = vld [vmem:[%s2890_s1 + $0x8] sm:$0xff]  ;;  %v171_v32 = vld [vmem:[%s2891_s5 + $0x60] sm:$0xff]  ;;  %v99_v34 = vld [vmem:[%s2890_s1 + $0x10] sm:$0xff] }
   0xa   :  { %37 = vperm.xlu0 %1610, %v31_v6   ;;  %103 = vperm.xlu1 %1611, %v97_v8   ;;  %v215_v33 = vld [vmem:[%s2891_s5 + $0xa0] sm:$0xff]  ;;  %v170_v38 = vld [vmem:[%s2891_s5 + $0x58] sm:$0xff]  ;;  %v169_v40 = vld [vmem:[%s2891_s5 + $0x50] sm:$0xff] }
   0xb   :  { %71 = vmatpush.msra.mxu0 %v62_v9  ;;  %143 = vmatpush.msra.mxu1 %v95_v22  ;;  %v214_v39 = vld [vmem:[%s2891_s5 + $0x98] sm:$0xff]  ;;  %v213_v41 = vld [vmem:[%s2891_s5 + $0x90] sm:$0xff]  ;;  %v168_v42 = vld [vmem:[%s2891_s5 + $0x48] sm:$0xff] }
   0xc   :  { %108 = vperm.xlu2 %1612, %v98_v31   ;;  %224 = vmatpush.msra.mxu3 %v215_v33  ;;  %v212_v43 = vld [vmem:[%s2891_s5 + $0x88] sm:$0xff]  ;;  %v167_v44 = vld [vmem:[%s2891_s5 + $0x40] sm:$0xff]  ;;  %v166_v46 = vld [vmem:[%s2891_s5 + $0x38] sm:$0xff] }
   0xd   :  { %72 = vmatpush.msra.mxu0 %v61_v10  ;;  %144 = vmatpush.msra.mxu1 %v94_v23  ;;  %v211_v45 = vld [vmem:[%s2891_s5 + $0x80] sm:$0xff]  ;;  %v210_v47 = vld [vmem:[%s2891_s5 + $0x78] sm:$0xff]  ;;  %v165_v48 = vld [vmem:[%s2891_s5 + $0x30] sm:$0xff] }
   0xe   :  { %1591 = vmatpush.msra.mxu2 %v171_v32  ;;  %225 = vmatpush.msra.mxu3 %v214_v39  ;;  %v209_v49 = vld [vmem:[%s2891_s5 + $0x70] sm:$0xff]  ;;  %v164_v50 = vld [vmem:[%s2891_s5 + $0x28] sm:$0xff]  ;;  %v1613_v52 = vld [vmem:[%s2891_s5 + $0x20] ss:$0 sm:$0xff] }
   0xf   :  { %73 = vmatpush.msra.mxu0 %v60_v11  ;;  %145 = vmatpush.msra.mxu1 %v93_v30  ;;  %v208_v51 = vld [vmem:[%s2891_s5 + $0x68] sm:$0xff]  ;;  %v1614_v55 = vld [vmem:[%s2891_s5 + $0x21] ss:$0 sm:$0xff]  ;;  %v264_v21 = vld [vmem:[%s2892_s3 + $0xb0] sm:$0xff] }
  0x10   :  { %1592 = vmatpush.msra.mxu2 %v170_v38  ;;  %226 = vmatpush.msra.mxu3 %v213_v41  ;;  %v246_v22 = vld [vmem:[%s2892_s3 + $0x20] sm:$0xff]  ;;  %v265_v23 = vld [vmem:[%s2892_s3 + $0xb8] sm:$0xff]  ;;  %v247_v24 = vld [vmem:[%s2892_s3 + $0x28] sm:$0xff] }
  0x11   :  { %74 = vmatpush.msra.mxu0 %v59_v12  ;;  %v250_v30 = vld [vmem:[%s2892_s3 + $0x40] sm:$0xff]  ;;  %v269_v31 = vld [vmem:[%s2892_s3 + $0xd8] sm:$0xff]  ;;  %v720_v41 = vld [vmem:[%s2893_s4 + $0x70] sm:$0xff] }
  0x12   :  { %1593 = vmatpush.msra.mxu2 %v169_v40  ;;  %227 = vmatpush.msra.mxu3 %v212_v43  ;;  %v270_v33 = vld [vmem:[%s2892_s3 + $0xe0] sm:$0xff]  ;;  %v273_v39 = vld [vmem:[%s2892_s3 + $0xf8] sm:$0xff]  ;;  %v255_v43 = vld [vmem:[%s2892_s3 + $0x68] sm:$0xff] }
  0x13   :  { %75 = vmatpush.msra.mxu0 %v58_v13 }
  0x14   :  { %113 = vperm.xlu2 %1612, %v99_v34   ;;  %1594 = vmatpush.msra.mxu2 %v168_v42  ;;  %v252_v34 = vld [vmem:[%s2892_s3 + $0x50] sm:$0xff] }
  0x15   :  { %76 = vmatpush.msra.mxu0 %v57_v14  ;;  %228 = vmatpush.msra.mxu3 %v211_v45  ;;  %v242_v14 = vld [vmem:[%s2892_s3] sm:$0xff] }
  0x16   :  { %1595 = vmatpush.msra.mxu2 %v167_v44  ;;  %v718_v45 = vld [vmem:[%s2893_s4 + $0x60] sm:$0xff] }
  0x17   :  { %77 = vmatpush.msra.mxu0 %v56_v15  ;;  %229 = vmatpush.msra.mxu3 %v210_v47  ;;  %v261_v15 = vld [vmem:[%s2892_s3 + $0x98] sm:$0xff] }
  0x18   :  { %1596 = vmatpush.msra.mxu2 %v166_v46  ;;  %v717_v47 = vld [vmem:[%s2893_s4 + $0x58] sm:$0xff] }
  0x19   :  { %78 = vmatpush.msra.mxu0 %v55_v16  ;;  %230 = vmatpush.msra.mxu3 %v209_v49  ;;  %v243_v16 = vld [vmem:[%s2892_s3 + $0x8] sm:$0xff]  ;;  %v716_v49 = vld [vmem:[%s2893_s4 + $0x50] sm:$0xff] }
  0x1a   :  { %1597 = vmatpush.msra.mxu2 %v165_v48 }
  0x1b   :  { %79 = vmatpush.msra.mxu0 %v54_v17  ;;  %231 = vmatpush.msra.mxu3 %v208_v51  ;;  %v262_v17 = vld [vmem:[%s2892_s3 + $0xa0] sm:$0xff]  ;;  %v715_v51 = vld [vmem:[%s2893_s4 + $0x48] sm:$0xff] }
  0x1c   :  { %1598 = vmatpush.msra.mxu2 %v164_v50 }
  0x1d   :  { %80 = vmatpush.msra.mxu0 %v53_v18  ;;  %v244_v18 = vld [vmem:[%s2892_s3 + $0x10] sm:$0xff] }
  0x1f   :  { %81 = vmatpush.msra.mxu0 %v52_v19  ;;  %v263_v19 = vld [vmem:[%s2892_s3 + $0xa8] sm:$0xff] }
  0x21   :  { %82 = vmatpush.msra.mxu0 %v51_v20  ;;  %v245_v20 = vld [vmem:[%s2892_s3 + $0x18] sm:$0xff] }
  0x23   :  { %190 = vmatpush.msrb.mxu0 %v171_v32  ;;  %v251_v32 = vld [vmem:[%s2892_s3 + $0x48] sm:$0xff] }
  0x25   :  { %191 = vmatpush.msrb.mxu0 %v170_v38  ;;  %v254_v38 = vld [vmem:[%s2892_s3 + $0x60] sm:$0xff] }
  0x27   :  { %192 = vmatpush.msrb.mxu0 %v169_v40  ;;  %v721_v40 = vld [vmem:[%s2893_s4 + $0x78] sm:$0xff] }
  0x29   :  { %193 = vmatpush.msrb.mxu0 %v168_v42  ;;  %v719_v42 = vld [vmem:[%s2893_s4 + $0x68] sm:$0xff] }
  0x2b   :  { %194 = vmatpush.msrb.mxu0 %v167_v44  ;;  %v274_v44 = vld [vmem:[%s2892_s3 + $0x100] sm:$0xff] }
  0x2d   :  { %195 = vmatpush.msrb.mxu0 %v166_v46  ;;  %v590_v46 = vld [vmem:[%s2893_s4 + $0x38] sm:$0xff] }
  0x2e   :  { %1599 = vmatpush.msrb.mxu3 %v590_v46 }
  0x2f   :  { %196 = vmatpush.msrb.mxu0 %v165_v48  ;;  %v589_v48 = vld [vmem:[%s2893_s4 + $0x30] sm:$0xff] }
  0x30   :  { %1600 = vmatpush.msrb.mxu3 %v589_v48 }
  0x31   :  { %197 = vmatpush.msrb.mxu0 %v164_v50  ;;  %v588_v50 = vld [vmem:[%s2893_s4 + $0x28] sm:$0xff] }
  0x32   :  { %1601 = vmatpush.msrb.mxu3 %v588_v50 }
  0x66   :  { %v109_v58 = vpop.permute.xlu2 %108 }
  0x67   :  { %v118_v60 = vmul.f32 %v1613_v52, %v109_v58  ;;  %v584_v58 = vld [vmem:[%s2893_s4 + $0x8] sm:$0xff] }
  0x6e   :  { %v114_v1 = vpop.permute.xlu2 %113 }
  0x6f   :  { %v119_v2 = vmul.f32 %v1613_v52, %v114_v1  ;;  %v258_v1 = vld [vmem:[%s2892_s3 + $0x80] sm:$0xff] }
  0x74   :  { %v35_v26 = vpop.permute.xlu0 %34  ;;  %v41_v29 = vpop.permute.xlu1 %40 }
  0x75   :  { %vm42_vm0 = vcmp.eq.s32.totalorder %v29_v25, %v35_v26  ;;  %vm44_vm2 = vcmp.eq.s32.totalorder %v29_v25, %v41_v29  ;;  %v248_v26 = vld [vmem:[%s2892_s3 + $0x30] sm:$0xff] }
  0x76   :  { %1497 = vmatmul.msk.f32.vlgmr.msra.gmra.mxu0 %vm42_vm0, %v1717_v27  ;;  %v268_v29 = vld [vmem:[%s2892_s3 + $0xd0] sm:$0xff] }
  0x77   :  { %732 = vmatpush.msra.mxu0 %v721_v40 }
  0x79   :  { %733 = vmatpush.msra.mxu0 %v720_v41 }
  0x7b   :  { %734 = vmatpush.msra.mxu0 %v719_v42 }
  0x7c   :  { %v38_v28 = vpop.permute.xlu0 %37  ;;  %v104_v53 = vpop.permute.xlu1 %103 }
  0x7d   :  { %vm43_vm1 = vcmp.eq.s32.totalorder %v29_v25, %v38_v28  ;;  %v117_v54 = vmul.f32 %v1613_v52, %v104_v53  ;;  %v266_v25 = vld [vmem:[%s2892_s3 + $0xc0] sm:$0xff]  ;;  %v249_v28 = vld [vmem:[%s2892_s3 + $0x38] sm:$0xff]  ;;  %735 = vmatpush.msra.mxu0 %v718_v45  ;;  %v256_v52 = vld [vmem:[%s2892_s3 + $0x70] sm:$0xff] }
  0x7e   :  { %1498 = vmatmul.msk.f32.gmra.mxu0 %vm43_vm1, %v1717_v27  ;;  %v275_v53 = vld [vmem:[%s2892_s3 + $0x108] sm:$0xff] }
  0x7f   :  { %736 = vmatpush.msra.mxu0 %v717_v47 }
  0x81   :  { %737 = vmatpush.msra.mxu0 %v716_v49 }
  0x83   :  { %738 = vmatpush.msra.mxu0 %v715_v51 }
  0x86   :  { %1499 = vmatmul.msk.f32.gmra.mxu0 %vm44_vm2, %v1717_v27  ;;  %v267_v27 = vld [vmem:[%s2892_s3 + $0xc8] sm:$0xff] }
  0xf3   :  { %v84_v35 = vpop.f32.mrf.mxu0 }
  0xf4   :  { %1500 = vmatmul.msk.f32.vlgmr.msra.gmra.mxu1 %vm120_vm3, %v84_v35  ;;  %v271_v35 = vld [vmem:[%s2892_s3 + $0xe8] sm:$0xff] }
  0xfb   :  { %v87_v36 = vpop.f32.mrf.mxu0 }
  0xfc   :  { %1501 = vmatmul.msk.f32.gmra.mxu1 %vm120_vm3, %v87_v36  ;;  %v253_v36 = vld [vmem:[%s2892_s3 + $0x58] sm:$0xff] }
 0x103   :  { %v90_v37 = vpop.f32.mrf.mxu0 }
 0x104   :  { %1502 = vmatmul.msk.f32.gmra.mxu1 %vm120_vm3, %v90_v37  ;;  %v272_v37 = vld [vmem:[%s2892_s3 + $0xf0] sm:$0xff] }
 0x171   :  { %v147_v56 = vpop.f32.mrf.mxu1 }
 0x172   :  { %v148_v57 = vadd.f32 %v147_v56, %v117_v54  ;;  %v587_v54 = vld [vmem:[%s2893_s4 + $0x20] sm:$0xff] }
 0x173   :  { %1602 = vmatpush.msrb.mxu3 %v587_v54  ;;  %v714_v56 = vld [vmem:[%s2893_s4 + $0x40] sm:$0xff] }
 0x174   :  { %v158_v59 = vadd.f32 %v1614_v55, %v148_v57  ;;  %v585_v57 = vld [vmem:[%s2893_s4 + $0x10] sm:$0xff]  ;;  %739 = vmatpush.msra.mxu0 %v714_v56 }
 0x176   :  { %1626 = vtanh.f32 %v158_v59  ;;  %v257_v59 = vld [vmem:[%s2892_s3 + $0x78] sm:$0xff] }
 0x179   :  { %v150_v61 = vpop.f32.mrf.mxu1 }
 0x17a   :  { %v151_v62 = vadd.f32 %v150_v61, %v118_v60  ;;  %v276_v60 = vld [vmem:[%s2892_s3 + $0x110] sm:$0xff]  ;;  %v583_v61 = vld [vmem:[%s2893_s4] sm:$0xff] }
 0x17c   :  { %v1627_v63 = vpop.eup %1626  ;;  %v159_v0 = vadd.f32 %v1614_v55, %v151_v62  ;;  %v836_v62 = vld [vmem:[%s2893_s4 + $0xb8] sm:$0xff] }
 0x17d   :  { %1503 = vmatmul.msk.f32.vlgmr.msrb.gmra.mxu0 %vm172_vm4, %v1627_v63  ;;  %1506 = vmatmul.msk.f32.vlgmr.msra.gmra.mxu3 %vm172_vm4, %v1627_v63  ;;  %v835_v63 = vld [vmem:[%s2893_s4 + $0xb0] sm:$0xff] }
 0x17e   :  { %1628 = vtanh.f32 %v159_v0  ;;  %v834_v0 = vld [vmem:[%s2893_s4 + $0xa8] sm:$0xff] }
 0x181   :  { %v153_v3 = vpop.f32.mrf.mxu1 }
 0x182   :  { %v154_v4 = vadd.f32 %v153_v3, %v119_v2  ;;  %v277_v3 = vld [vmem:[%s2892_s3 + $0x118] sm:$0xff] }
 0x184   :  { %v1629_v5 = vpop.eup %1628  ;;  %v160_v6 = vadd.f32 %v1614_v55, %v154_v4  ;;  %v586_v55 = vld [vmem:[%s2893_s4 + $0x18] sm:$0xff]  ;;  %v833_v4 = vld [vmem:[%s2893_s4 + $0xa0] sm:$0xff] }
 0x185   :  { %1504 = vmatmul.msk.f32.gmra.mxu0 %vm172_vm4, %v1629_v5  ;;  %1507 = vmatmul.msk.f32.gmra.mxu3 %vm172_vm4, %v1629_v5  ;;  %v832_v5 = vld [vmem:[%s2893_s4 + $0x98] sm:$0xff] }
 0x186   :  { %1630 = vtanh.f32 %v160_v6  ;;  %1603 = vmatpush.msrb.mxu3 %v586_v55  ;;  %v831_v6 = vld [vmem:[%s2893_s4 + $0x90] sm:$0xff] }
 0x188   :  { %1604 = vmatpush.msrb.mxu3 %v585_v57 }
 0x18a   :  { %1605 = vmatpush.msrb.mxu3 %v584_v58 }
 0x18c   :  { %v1631_v7 = vpop.eup %1630  ;;  %1606 = vmatpush.msrb.mxu3 %v583_v61 }
 0x18d   :  { %1505 = vmatmul.msk.f32.vlgmr.msra.gmra.mxu2 %vm172_vm4, %v1631_v7  ;;  %1508 = vmatmul.msk.f32.gmra.mxu3 %vm172_vm4, %v1631_v7  ;;  %v2110_v7 = vld [vmem:[%s2891_s5 + $0x22] ss:$0 sm:$0xff] }
 0x18e   :  { %895 = vmatpush.msra.mxu3 %v836_v62 }
 0x190   :  { %896 = vmatpush.msra.mxu3 %v835_v63 }
 0x192   :  { %897 = vmatpush.msra.mxu3 %v834_v0 }
 0x194   :  { %898 = vmatpush.msra.mxu3 %v833_v4 }
 0x196   :  { %899 = vmatpush.msra.mxu3 %v832_v5 }
 0x198   :  { %900 = vmatpush.msra.mxu3 %v831_v6 }
 0x1fa   :  { %v199_v9 = vpop.f32.mrf.mxu0 }
 0x200   :  { %v233_v8 = vpop.f32.mrf.mxu3 }
 0x202   :  { %v202_v13 = vpop.f32.mrf.mxu0 }
 0x208   :  { %v236_v10 = vpop.f32.mrf.mxu3 }
 0x210   :  { %v205_v11 = vpop.f32.mrf.mxu2  ;;  %v239_v12 = vpop.f32.mrf.mxu3 }
 0x211   :  { %351 = vmatpush.msrb.mxu1 %v239_v12  ;;  %482 = vmatpush.msrb.mxu2 %v205_v11  ;;  %v259_v11 = vld [vmem:[%s2892_s3 + $0x88] sm:$0xff] }
 0x213   :  { %352 = vmatpush.msrb.mxu1 %v236_v10  ;;  %483 = vmatpush.msrb.mxu2 %v202_v13  ;;  %v278_v13 = vld [vmem:[%s2892_s3 + $0x120] sm:$0xff] }
 0x215   :  { %353 = vmatpush.msrb.mxu1 %v233_v8  ;;  %484 = vmatpush.msrb.mxu2 %v199_v9  ;;  %v830_v9 = vld [vmem:[%s2893_s4 + $0x88] sm:$0xff] }
 0x216   :  { %1528 = vmatmul.msk.f32.vlgmr.msrb.gmra.mxu2 %vm280_vm5, %v242_v14  ;;  %1509 = vmatmul.msk.f32.vlgmr.msrb.gmra.mxu1 %vm280_vm5, %v261_v15  ;;  %v829_v14 = vld [vmem:[%s2893_s4 + $0x80] sm:$0xff] }
 0x217   :  { %610 = vmatpush.msra.mxu2 %v590_v46  ;;  %901 = vmatpush.msra.mxu3 %v830_v9 }
 0x219   :  { %611 = vmatpush.msra.mxu2 %v589_v48  ;;  %902 = vmatpush.msra.mxu3 %v829_v14 }
 0x21b   :  { %612 = vmatpush.msra.mxu2 %v588_v50 }
 0x21d   :  { %613 = vmatpush.msra.mxu2 %v587_v54 }
 0x21e   :  { %1529 = vmatmul.msk.f32.gmra.mxu2 %vm280_vm5, %v243_v16  ;;  %1510 = vmatmul.msk.f32.gmra.mxu1 %vm280_vm5, %v262_v17 }
 0x21f   :  { %614 = vmatpush.msra.mxu2 %v586_v55 }
 0x221   :  { %615 = vmatpush.msra.mxu2 %v585_v57 }
 0x223   :  { %616 = vmatpush.msra.mxu2 %v584_v58 }
 0x225   :  { %617 = vmatpush.msra.mxu2 %v583_v61 }
 0x226   :  { %1530 = vmatmul.msk.f32.gmra.mxu2 %vm280_vm5, %v244_v18  ;;  %1511 = vmatmul.msk.f32.gmra.mxu1 %vm280_vm5, %v263_v19  ;;  %v260_v18 = vld [vmem:[%s2892_s3 + $0x90] sm:$0xff] }
 0x22e   :  { %1531 = vmatmul.msk.f32.gmra.mxu2 %vm280_vm5, %v245_v20  ;;  %1512 = vmatmul.msk.f32.gmra.mxu1 %vm280_vm5, %v264_v21  ;;  %v279_v20 = vld [vmem:[%s2892_s3 + $0x128] sm:$0xff] }
 0x236   :  { %1532 = vmatmul.msk.f32.gmra.mxu2 %vm280_vm5, %v246_v22  ;;  %1513 = vmatmul.msk.f32.gmra.mxu1 %vm280_vm5, %v265_v23 }
 0x23e   :  { %1533 = vmatmul.msk.f32.gmra.mxu2 %vm280_vm5, %v247_v24  ;;  %1514 = vmatmul.msk.f32.gmra.mxu1 %vm280_vm5, %v266_v25 }
 0x246   :  { %1534 = vmatmul.msk.f32.gmra.mxu2 %vm280_vm5, %v248_v26  ;;  %1515 = vmatmul.msk.f32.gmra.mxu1 %vm280_vm5, %v267_v27 }
 0x24e   :  { %1535 = vmatmul.msk.f32.gmra.mxu2 %vm280_vm5, %v249_v28  ;;  %1516 = vmatmul.msk.f32.gmra.mxu1 %vm280_vm5, %v268_v29 }
 0x256   :  { %1536 = vmatmul.msk.f32.gmra.mxu2 %vm280_vm5, %v250_v30  ;;  %1517 = vmatmul.msk.f32.gmra.mxu1 %vm280_vm5, %v269_v31 }
 0x25e   :  { %1537 = vmatmul.msk.f32.gmra.mxu2 %vm280_vm5, %v251_v32  ;;  %1518 = vmatmul.msk.f32.gmra.mxu1 %vm280_vm5, %v270_v33 }
 0x266   :  { %1538 = vmatmul.msk.f32.gmra.mxu2 %vm280_vm5, %v252_v34  ;;  %1519 = vmatmul.msk.f32.gmra.mxu1 %vm280_vm5, %v271_v35 }
 0x26e   :  { %1539 = vmatmul.msk.f32.gmra.mxu2 %vm280_vm5, %v253_v36  ;;  %1520 = vmatmul.msk.f32.gmra.mxu1 %vm280_vm5, %v272_v37 }
 0x276   :  { %1540 = vmatmul.msk.f32.gmra.mxu2 %vm280_vm5, %v254_v38  ;;  %1521 = vmatmul.msk.f32.gmra.mxu1 %vm280_vm5, %v273_v39 }
 0x27e   :  { %1541 = vmatmul.msk.f32.gmra.mxu2 %vm280_vm5, %v255_v43  ;;  %1522 = vmatmul.msk.f32.gmra.mxu1 %vm280_vm5, %v274_v44 }
 0x286   :  { %1542 = vmatmul.msk.f32.gmra.mxu2 %vm280_vm5, %v256_v52  ;;  %1523 = vmatmul.msk.f32.gmra.mxu1 %vm280_vm5, %v275_v53 }
 0x28e   :  { %1543 = vmatmul.msk.f32.gmra.mxu2 %vm280_vm5, %v257_v59  ;;  %1524 = vmatmul.msk.f32.gmra.mxu1 %vm280_vm5, %v276_v60 }
 0x293   :  { %v355_v2 = vpop.f32.mrf.mxu1 }
 0x296   :  { %1544 = vmatmul.msk.f32.gmra.mxu2 %vm280_vm5, %v258_v1  ;;  %1525 = vmatmul.msk.f32.gmra.mxu1 %vm280_vm5, %v277_v3 }
 0x299   :  { %v486_v8 = vpop.f32.mrf.mxu2 }
 0x29a   :  { %v487_v10 = vadd.f32 %v486_v8, %v355_v2 }
 0x29b   :  { %v358_v12 = vpop.f32.mrf.mxu1 }
 0x29c   :  { %v545_v15 = vadd.f32 %v2110_v7, %v487_v10 }
 0x29e   :  { %1632 = vtanh.f32 %v545_v15  ;;  %1545 = vmatmul.msk.f32.gmra.mxu2 %vm280_vm5, %v259_v11  ;;  %1526 = vmatmul.msk.f32.gmra.mxu1 %vm280_vm5, %v278_v13 }
 0x2a1   :  { %v489_v16 = vpop.f32.mrf.mxu2 }
 0x2a2   :  { %v490_v17 = vadd.f32 %v489_v16, %v358_v12 }
 0x2a3   :  { %v361_v19 = vpop.f32.mrf.mxu1 }
 0x2a4   :  { %v1633_v21 = vpop.eup %1632  ;;  %v546_v22 = vadd.f32 %v2110_v7, %v490_v17 }
 0x2a5   :  { %1550 = vmatmul.msk.f32.vlgmr.msra.gmra.mxu0 %vm172_vm4, %v1633_v21 }
 0x2a6   :  { %1634 = vtanh.f32 %v546_v22  ;;  %1546 = vmatmul.msk.f32.gmra.mxu2 %vm280_vm5, %v260_v18  ;;  %1527 = vmatmul.msk.f32.gmra.mxu1 %vm280_vm5, %v279_v20 }
 0x2a9   :  { %v492_v23 = vpop.f32.mrf.mxu2 }
 0x2aa   :  { %v493_v24 = vadd.f32 %v492_v23, %v361_v19 }
 0x2ab   :  { %v364_v25 = vpop.f32.mrf.mxu1 }
 0x2ac   :  { %v1635_v26 = vpop.eup %1634  ;;  %v547_v27 = vadd.f32 %v2110_v7, %v493_v24 }
 0x2ad   :  { %1548 = vmatmul.msk.f32.vlgmr.msrb.gmra.mxu3 %vm172_vm4, %v1635_v26  ;;  %1551 = vmatmul.msk.f32.gmra.mxu0 %vm172_vm4, %v1635_v26 }
 0x2ae   :  { %1636 = vtanh.f32 %v547_v27  ;;  %1547 = vmatmul.msk.f32.vlgmr.msra.gmra.mxu2 %vm172_vm4, %v1633_v21 }
 0x2b1   :  { %v495_v28 = vpop.f32.mrf.mxu2 }
 0x2b2   :  { %v496_v29 = vadd.f32 %v495_v28, %v364_v25 }
 0x2b3   :  { %v367_v30 = vpop.f32.mrf.mxu1 }
 0x2b4   :  { %v1637_v31 = vpop.eup %1636  ;;  %v548_v32 = vadd.f32 %v2110_v7, %v496_v29 }
 0x2b5   :  { %1549 = vmatmul.msk.f32.gmra.mxu3 %vm172_vm4, %v1637_v31  ;;  %1552 = vmatmul.msk.f32.gmra.mxu0 %vm172_vm4, %v1637_v31 }
 0x2b6   :  { %1638 = vtanh.f32 %v548_v32 }
 0x2b9   :  { %v498_v33 = vpop.f32.mrf.mxu2 }
 0x2ba   :  { %v499_v34 = vadd.f32 %v498_v33, %v367_v30 }
 0x2bb   :  { %v370_v35 = vpop.f32.mrf.mxu1 }
 0x2bc   :  { %v1639_v36 = vpop.eup %1638  ;;  %v549_v37 = vadd.f32 %v2110_v7, %v499_v34 }
 0x2bd   :  { %1553 = vmatmul.msk.f32.vlgmr.msra.gmra.mxu3 %vm172_vm4, %v1639_v36 }
 0x2be   :  { %1640 = vtanh.f32 %v549_v37 }
 0x2c1   :  { %v501_v38 = vpop.f32.mrf.mxu2 }
 0x2c2   :  { %v502_v39 = vadd.f32 %v501_v38, %v370_v35 }
 0x2c3   :  { %v373_v40 = vpop.f32.mrf.mxu1 }
 0x2c4   :  { %v1641_v41 = vpop.eup %1640  ;;  %v550_v42 = vadd.f32 %v2110_v7, %v502_v39 }
 0x2c5   :  { %1554 = vmatmul.msk.f32.gmra.mxu3 %vm172_vm4, %v1641_v41 }
 0x2c6   :  { %1642 = vtanh.f32 %v550_v42 }
 0x2c9   :  { %v504_v43 = vpop.f32.mrf.mxu2 }
 0x2ca   :  { %v505_v44 = vadd.f32 %v504_v43, %v373_v40 }
 0x2cb   :  { %v376_v45 = vpop.f32.mrf.mxu1 }
 0x2cc   :  { %v1643_v46 = vpop.eup %1642  ;;  %v551_v47 = vadd.f32 %v2110_v7, %v505_v44 }
 0x2cd   :  { %1555 = vmatmul.msk.f32.gmra.mxu3 %vm172_vm4, %v1643_v46 }
 0x2ce   :  { %1644 = vtanh.f32 %v551_v47 }
 0x2d1   :  { %v507_v48 = vpop.f32.mrf.mxu2 }
 0x2d2   :  { %v508_v49 = vadd.f32 %v507_v48, %v376_v45 }
 0x2d3   :  { %v379_v50 = vpop.f32.mrf.mxu1 }
 0x2d4   :  { %v1645_v51 = vpop.eup %1644  ;;  %v552_v52 = vadd.f32 %v2110_v7, %v508_v49 }
 0x2d5   :  { %1556 = vmatmul.msk.f32.gmra.mxu3 %vm172_vm4, %v1645_v51 }
 0x2d6   :  { %1646 = vtanh.f32 %v552_v52 }
 0x2d9   :  { %v510_v53 = vpop.f32.mrf.mxu2 }
 0x2da   :  { %v511_v54 = vadd.f32 %v510_v53, %v379_v50 }
 0x2db   :  { %v382_v55 = vpop.f32.mrf.mxu1 }
 0x2dc   :  { %v1647_v56 = vpop.eup %1646  ;;  %v553_v57 = vadd.f32 %v2110_v7, %v511_v54 }
 0x2dd   :  { %1557 = vmatmul.msk.f32.gmra.mxu3 %vm172_vm4, %v1647_v56 }
 0x2de   :  { %1648 = vtanh.f32 %v553_v57 }
 0x2e1   :  { %v513_v58 = vpop.f32.mrf.mxu2 }
 0x2e2   :  { %v514_v59 = vadd.f32 %v513_v58, %v382_v55 }
 0x2e3   :  { %v385_v60 = vpop.f32.mrf.mxu1 }
 0x2e4   :  { %v1649_v61 = vpop.eup %1648  ;;  %v554_v62 = vadd.f32 %v2110_v7, %v514_v59  ;;  %v2186_v59 = vld [vmem:[%s2893_s4 + $0xc6] ss:$0 sm:$0xff] }
 0x2e5   :  { %1558 = vmatmul.msk.f32.gmra.mxu3 %vm172_vm4, %v1649_v61 }
 0x2e6   :  { %1650 = vtanh.f32 %v554_v62 }
 0x2e9   :  { %v516_v63 = vpop.f32.mrf.mxu2 }
 0x2ea   :  { %v517_v0 = vadd.f32 %v516_v63, %v385_v60 }
 0x2eb   :  { %v388_v1 = vpop.f32.mrf.mxu1 }
 0x2ec   :  { %v1651_v2 = vpop.eup %1650  ;;  %v555_v3 = vadd.f32 %v2110_v7, %v517_v0 }
 0x2ed   :  { %1559 = vmatmul.msk.f32.gmra.mxu3 %vm172_vm4, %v1651_v2 }
 0x2ee   :  { %1652 = vtanh.f32 %v555_v3 }
 0x2f1   :  { %v519_v4 = vpop.f32.mrf.mxu2 }
 0x2f2   :  { %v520_v5 = vadd.f32 %v519_v4, %v388_v1 }
 0x2f3   :  { %v391_v6 = vpop.f32.mrf.mxu1 }
 0x2f4   :  { %v1653_v8 = vpop.eup %1652  ;;  %v556_v9 = vadd.f32 %v2110_v7, %v520_v5 }
 0x2f5   :  { %1560 = vmatmul.msk.f32.gmra.mxu3 %vm172_vm4, %v1653_v8 }
 0x2f6   :  { %1654 = vtanh.f32 %v556_v9 }
 0x2f9   :  { %v522_v10 = vpop.f32.mrf.mxu2 }
 0x2fa   :  { %v523_v11 = vadd.f32 %v522_v10, %v391_v6 }
 0x2fb   :  { %v394_v12 = vpop.f32.mrf.mxu1 }
 0x2fc   :  { %v1655_v13 = vpop.eup %1654  ;;  %v557_v14 = vadd.f32 %v2110_v7, %v523_v11 }
 0x2fd   :  { %1561 = vmatmul.msk.f32.gmra.mxu3 %vm172_vm4, %v1655_v13 }
 0x2fe   :  { %1656 = vtanh.f32 %v557_v14 }
 0x301   :  { %v525_v15 = vpop.f32.mrf.mxu2 }
 0x302   :  { %v526_v16 = vadd.f32 %v525_v15, %v394_v12 }
 0x303   :  { %v397_v17 = vpop.f32.mrf.mxu1 }
 0x304   :  { %v1657_v18 = vpop.eup %1656  ;;  %v558_v19 = vadd.f32 %v2110_v7, %v526_v16 }
 0x305   :  { %1562 = vmatmul.msk.f32.gmra.mxu3 %vm172_vm4, %v1657_v18 }
 0x306   :  { %1658 = vtanh.f32 %v558_v19 }
 0x309   :  { %v528_v20 = vpop.f32.mrf.mxu2 }
 0x30a   :  { %v529_v21 = vadd.f32 %v528_v20, %v397_v17 }
 0x30b   :  { %v400_v22 = vpop.f32.mrf.mxu1 }
 0x30c   :  { %v1659_v23 = vpop.eup %1658  ;;  %v559_v24 = vadd.f32 %v2110_v7, %v529_v21  ;;  %v1617_v21 = vld [vmem:[%s2893_s4 + $0xc0] ss:$0 sm:$0xff] }
 0x30d   :  { %1563 = vmatmul.msk.f32.gmra.mxu3 %vm172_vm4, %v1659_v23 }
 0x30e   :  { %1660 = vtanh.f32 %v559_v24 }
 0x311   :  { %v531_v25 = vpop.f32.mrf.mxu2 }
 0x312   :  { %v532_v26 = vadd.f32 %v531_v25, %v400_v22 }
 0x313   :  { %v403_v27 = vpop.f32.mrf.mxu1 }
 0x314   :  { %v1661_v28 = vpop.eup %1660  ;;  %v560_v29 = vadd.f32 %v2110_v7, %v532_v26 }
 0x315   :  { %1564 = vmatmul.msk.f32.gmra.mxu3 %vm172_vm4, %v1661_v28 }
 0x316   :  { %1662 = vtanh.f32 %v560_v29 }
 0x319   :  { %v534_v30 = vpop.f32.mrf.mxu2 }
 0x31a   :  { %v535_v31 = vadd.f32 %v534_v30, %v403_v27 }
 0x31b   :  { %v406_v34 = vpop.f32.mrf.mxu1 }
 0x31c   :  { %v1663_v32 = vpop.eup %1662  ;;  %v561_v33 = vadd.f32 %v2110_v7, %v535_v31 }
 0x31d   :  { %1565 = vmatmul.msk.f32.gmra.mxu3 %vm172_vm4, %v1663_v32 }
 0x31e   :  { %1664 = vtanh.f32 %v561_v33 }
 0x321   :  { %v537_v35 = vpop.f32.mrf.mxu2 }
 0x322   :  { %v538_v36 = vadd.f32 %v537_v35, %v406_v34 }
 0x323   :  { %v409_v39 = vpop.f32.mrf.mxu1 }
 0x324   :  { %v1665_v37 = vpop.eup %1664  ;;  %v562_v38 = vadd.f32 %v2110_v7, %v538_v36  ;;  %v1718_v36 = vmov 32.0  }
 0x325   :  { %1566 = vmatmul.msk.f32.gmra.mxu3 %vm172_vm4, %v1665_v37 }
 0x326   :  { %1666 = vtanh.f32 %v562_v38 }
 0x329   :  { %v540_v40 = vpop.f32.mrf.mxu2 }
 0x32a   :  { %v541_v41 = vadd.f32 %v540_v40, %v409_v39 }
 0x32c   :  { %v1667_v42 = vpop.eup %1666  ;;  %v563_v43 = vadd.f32 %v2110_v7, %v541_v41 }
 0x32d   :  { %1567 = vmatmul.msk.f32.gmra.mxu3 %vm172_vm4, %v1667_v42 }
 0x32e   :  { %1668 = vtanh.f32 %v563_v43 }
 0x32f   :  { %1670 = vrcp.f32 %v1718_v36 }
 0x330   :  { %v2174_v44 = vpop.f32.mrf.mxu3 }
 0x331   :  { %v619_v24 = vpop.f32.mrf.mxu2  ;;  %v2266_v32 = vadd.f32 %v1617_v21, %v2174_v44 }
 0x332   :  { %v2251_v26 = vadd.f32 %v1617_v21, %v619_v24  ;;  %v1616_v24 = vld [vmem:[%s2893_s4 + $0xc3] ss:$0 sm:$0xff] }
 0x333   :  { %v633_v34 = vsel %vm120_vm3, %v2266_v32, 0.0 }
 0x334   :  { %v1669_v45 = vpop.eup %1668  ;;  %v630_v30 = vsel %vm120_vm3, %v2251_v26, 0.0 }
 0x335   :  { %1568 = vmatmul.msk.f32.gmra.mxu3 %vm172_vm4, %v1669_v45  ;;  %v1671_v37 = vpop.eup %1670 }
 0x336   :  { %v640_v38 = vmul.f32 32.0, %v1671_v37  ;;  %vm644_vm6 = vweird.f32 %v1671_v37 }
 0x338   :  { %v2177_v46 = vpop.f32.mrf.mxu3  ;;  %v641_v39 = vsub.f32 1.0, %v640_v38 }
 0x339   :  { %v2269_v33 = vadd.f32 %v1617_v21, %v2177_v46 }
 0x33a   :  { %v642_v40 = vmul.f32 %v1671_v37, %v641_v39 }
 0x33b   :  { %v636_v35 = vsel %vm120_vm3, %v2269_v33, 0.0 }
 0x33c   :  { %v643_v41 = vadd.f32 %v1671_v37, %v642_v40 }
 0x33e   :  { %v2275_v42 = vsel %vm644_vm6, %v1671_v37, %v643_v41 }
 0x340   :  { %v2179_v47 = vpop.f32.mrf.mxu3 }
 0x348   :  { %v2181_v48 = vpop.f32.mrf.mxu3 }
 0x350   :  { %v910_v49 = vpop.f32.mrf.mxu3 }
 0x351   :  { %v2254_v27 = vadd.f32 %v2186_v59, %v910_v49 }
 0x353   :  { %v960_v29 = vsel %vm120_vm3, %v2254_v27, 0.0 }
 0x358   :  { %v913_v50 = vpop.f32.mrf.mxu3 }
 0x359   :  { %v2257_v28 = vadd.f32 %v2186_v59, %v913_v50 }
 0x35b   :  { %v963_v31 = vsel %vm120_vm3, %v2257_v28, 0.0 }
 0x360   :  { %v916_v51 = vpop.f32.mrf.mxu3 }
 0x361   :  { %v2240_v20 = vadd.f32 %v2186_v59, %v916_v51 }
 0x363   :  { %v966_v25 = vsel %vm120_vm3, %v2240_v20, 0.0 }
 0x368   :  { %v919_v52 = vpop.f32.mrf.mxu3 }
 0x369   :  { %v2234_v18 = vadd.f32 %v2186_v59, %v919_v52 }
 0x36b   :  { %v969_v23 = vsel %vm120_vm3, %v2234_v18, 0.0 }
 0x370   :  { %v922_v53 = vpop.f32.mrf.mxu3 }
 0x371   :  { %v2225_v14 = vadd.f32 %v2186_v59, %v922_v53 }
 0x373   :  { %v972_v17 = vsel %vm120_vm3, %v2225_v14, 0.0 }
 0x378   :  { %v925_v7 = vpop.f32.mrf.mxu3 }
 0x379   :  { %v2219_v12 = vadd.f32 %v2186_v59, %v925_v7 }
 0x37b   :  { %v975_v16 = vsel %vm120_vm3, %v2219_v12, 0.0 }
 0x380   :  { %v928_v54 = vpop.f32.mrf.mxu3 }
 0x381   :  { %v2237_v19 = vadd.f32 %v2186_v59, %v928_v54 }
 0x383   :  { %v978_v22 = vsel %vm120_vm3, %v2237_v19, 0.0 }
 0x388   :  { %v931_v55 = vpop.f32.mrf.mxu3 }
 0x389   :  { %v2207_v5 = vadd.f32 %v2186_v59, %v931_v55 }
 0x38b   :  { %v981_v11 = vsel %vm120_vm3, %v2207_v5, 0.0 }
 0x390   :  { %v934_v56 = vpop.f32.mrf.mxu3 }
 0x391   :  { %v2204_v4 = vadd.f32 %v2186_v59, %v934_v56 }
 0x393   :  { %v984_v10 = vsel %vm120_vm3, %v2204_v4, 0.0 }
 0x398   :  { %v937_v57 = vpop.f32.mrf.mxu3 }
 0x399   :  { %v2222_v13 = vadd.f32 %v2186_v59, %v937_v57 }
 0x39b   :  { %v987_v15 = vsel %vm120_vm3, %v2222_v13, 0.0 }
 0x3a0   :  { %v940_v58 = vpop.f32.mrf.mxu3 }
 0x3a1   :  { %v2194_v63 = vadd.f32 %v2186_v59, %v940_v58 }
 0x3a3   :  { %v990_v3 = vsel %vm120_vm3, %v2194_v63, 0.0 }
 0x3a8   :  { %v943_v60 = vpop.f32.mrf.mxu3 }
 0x3a9   :  { %v2189_v61 = vadd.f32 %v2186_v59, %v943_v60 }
 0x3ab   :  { %v993_v62 = vsel %vm120_vm3, %v2189_v61, 0.0 }
 0x3ac   :  { %994 = vadd.xlane.f32.xlu2 %v993_v62 }
 0x3b0   :  { %v946_v0 = vpop.f32.mrf.mxu3 }
 0x3b1   :  { %v2197_v1 = vadd.f32 %v2186_v59, %v946_v0 }
 0x3b3   :  { %v996_v2 = vsel %vm120_vm3, %v2197_v1, 0.0 }
 0x3b4   :  { %997 = vadd.xlane.f32.xlu1 %v996_v2  ;;  %991 = vadd.xlane.f32.xlu2 %v990_v3 }
 0x3b8   :  { %v949_v6 = vpop.f32.mrf.mxu3 }
 0x3b9   :  { %v2210_v8 = vadd.f32 %v2186_v59, %v949_v6 }
 0x3bb   :  { %v999_v9 = vsel %vm120_vm3, %v2210_v8, 0.0 }
 0x3bc   :  { %1000 = vadd.xlane.f32.xlu0 %v999_v9  ;;  %985 = vadd.xlane.f32.xlu1 %v984_v10 }
 0x3bd   :  { %982 = vadd.xlane.f32.xlu2 %v981_v11 }
 0x3c4   :  { %988 = vadd.xlane.f32.xlu0 %v987_v15  ;;  %976 = vadd.xlane.f32.xlu1 %v975_v16 }
 0x3c5   :  { %973 = vadd.xlane.f32.xlu2 %v972_v17  ;;  %v741_v17 = vpop.f32.mrf.mxu0 }
 0x3cc   :  { %979 = vadd.xlane.f32.xlu0 %v978_v22  ;;  %970 = vadd.xlane.f32.xlu1 %v969_v23 }
 0x3cd   :  { %967 = vadd.xlane.f32.xlu2 %v966_v25  ;;  %v744_v38 = vpop.f32.mrf.mxu0 }
 0x3d4   :  { %961 = vadd.xlane.f32.xlu1 %v960_v29  ;;  %631 = vadd.xlane.f32.xlu0 %v630_v30 }
 0x3d5   :  { %964 = vadd.xlane.f32.xlu2 %v963_v31  ;;  %v2339_v31 = vadd.f32 %v1616_v24, %v741_v17 }
 0x3dc   :  { %634 = vadd.xlane.f32.xlu0 %v633_v34 }
 0x3dd   :  { %637 = vadd.xlane.f32.xlu2 %v636_v35 }
 0x41f   :  { %v995_v43 = vpop.xlane.xlu2 %994 }
 0x420   :  { %v1015_v44 = vmul.f32 %v995_v43, %v2275_v42 }
 0x422   :  { %v2279_v45 = vsub.f32 %v2189_v61, %v1015_v44 }
 0x424   :  { %v1047_v46 = vmul.f32 %v2279_v45, %v2279_v45 }
 0x426   :  { %v1089_v49 = vsel %vm120_vm3, %v1047_v46, 0.0 }
 0x427   :  { %v998_v50 = vpop.xlane.xlu1 %997  ;;  %v992_v51 = vpop.xlane.xlu2 %991  ;;  %1090 = vadd.xlane.f32.xlu0 %v1089_v49  ;;  %v2360_v49 = vadd.f32 %v1616_v24, %v744_v38 }
 0x428   :  { %v1016_v52 = vmul.f32 %v998_v50, %v2275_v42  ;;  %v1014_v53 = vmul.f32 %v992_v51, %v2275_v42 }
 0x42a   :  { %v2287_v7 = vsub.f32 %v2197_v1, %v1016_v52  ;;  %v2290_v54 = vsub.f32 %v2194_v63, %v1014_v53  ;;  %v2301_v63 = vadd.f32 %v2186_v59, %v2179_v47 }
 0x42c   :  { %v1046_v55 = vmul.f32 %v2290_v54, %v2290_v54  ;;  %v1048_v56 = vmul.f32 %v2287_v7, %v2287_v7  ;;  %v954_v9 = vsel %vm120_vm3, %v2301_v63, 0.0 }
 0x42e   :  { %v1086_v57 = vsel %vm120_vm3, %v1046_v55, 0.0  ;;  %v1092_v58 = vsel %vm120_vm3, %v1048_v56, 0.0  ;;  %v755_v56 = vsel %vm120_vm3, %v2360_v49, 0.0 }
 0x42f   :  { %v1001_v60 = vpop.xlane.xlu0 %1000  ;;  %1087 = vadd.xlane.f32.xlu2 %v1086_v57  ;;  %1093 = vadd.xlane.f32.xlu0 %v1092_v58  ;;  %v986_v62 = vpop.xlane.xlu1 %985 }
 0x430   :  { %v1017_v61 = vmul.f32 %v1001_v60, %v2275_v42  ;;  %v983_v0 = vpop.xlane.xlu2 %982  ;;  %v1012_v2 = vmul.f32 %v986_v62, %v2275_v42  ;;  %v747_v57 = vpop.f32.mrf.mxu0 }
 0x431   :  { %v1011_v15 = vmul.f32 %v983_v0, %v2275_v42  ;;  %v2378_v0 = vadd.f32 %v1616_v24, %v747_v57 }
 0x432   :  { %v2304_v1 = vsub.f32 %v2210_v8, %v1017_v61  ;;  %v2313_v10 = vsub.f32 %v2204_v4, %v1012_v2  ;;  %v2318_v8 = vadd.f32 %v2186_v59, %v2181_v48 }
 0x433   :  { %v2332_v48 = vsub.f32 %v2207_v5, %v1011_v15  ;;  %v758_v15 = vsel %vm120_vm3, %v2378_v0, 0.0 }
 0x434   :  { %v1049_v3 = vmul.f32 %v2304_v1, %v2304_v1  ;;  %v1044_v4 = vmul.f32 %v2313_v10, %v2313_v10  ;;  %v957_v59 = vsel %vm120_vm3, %v2318_v8, 0.0 }
 0x435   :  { %v1043_v35 = vmul.f32 %v2332_v48, %v2332_v48 }
 0x436   :  { %v1095_v6 = vsel %vm120_vm3, %v1049_v3, 0.0  ;;  %v1080_v29 = vsel %vm120_vm3, %v1044_v4, 0.0 }
 0x437   :  { %v989_v11 = vpop.xlane.xlu0 %988  ;;  %1096 = vadd.xlane.f32.xlu1 %v1095_v6  ;;  %955 = vadd.xlane.f32.xlu0 %v954_v9  ;;  %v977_v22 = vpop.xlane.xlu1 %976  ;;  %v1077_v43 = vsel %vm120_vm3, %v1043_v35, 0.0 }
 0x438   :  { %v1013_v47 = vmul.f32 %v989_v11, %v2275_v42  ;;  %v974_v21 = vpop.xlane.xlu2 %973  ;;  %v1009_v34 = vmul.f32 %v977_v22, %v2275_v42 }
 0x439   :  { %v1008_v36 = vmul.f32 %v974_v21, %v2275_v42 }
 0x43a   :  { %v2322_v16 = vsub.f32 %v2222_v13, %v1013_v47  ;;  %v2351_v40 = vsub.f32 %v2219_v12, %v1009_v34 }
 0x43b   :  { %v2358_v46 = vsub.f32 %v2225_v14, %v1008_v36 }
 0x43c   :  { %v1045_v23 = vmul.f32 %v2322_v16, %v2322_v16  ;;  %v1041_v12 = vmul.f32 %v2351_v40, %v2351_v40 }
 0x43d   :  { %v1040_v52 = vmul.f32 %v2358_v46, %v2358_v46 }
 0x43e   :  { %v1083_v13 = vsel %vm120_vm3, %v1045_v23, 0.0  ;;  %v1071_v14 = vsel %vm120_vm3, %v1041_v12, 0.0 }
 0x43f   :  { %v980_v25 = vpop.xlane.xlu0 %979  ;;  %958 = vadd.xlane.f32.xlu1 %v957_v59  ;;  %1084 = vadd.xlane.f32.xlu2 %v1083_v13  ;;  %v971_v41 = vpop.xlane.xlu1 %970  ;;  %v1068_v61 = vsel %vm120_vm3, %v1040_v52, 0.0 }
 0x440   :  { %v1010_v30 = vmul.f32 %v980_v25, %v2275_v42  ;;  %1081 = vadd.xlane.f32.xlu0 %v1080_v29  ;;  %v968_v39 = vpop.xlane.xlu2 %967  ;;  %v1007_v50 = vmul.f32 %v971_v41, %v2275_v42 }
 0x441   :  { %v1006_v51 = vmul.f32 %v968_v39, %v2275_v42 }
 0x442   :  { %v2343_v5 = vsub.f32 %v2237_v19, %v1010_v30  ;;  %v752_v19 = vsel %vm120_vm3, %v2339_v31, 0.0  ;;  %v2369_v55 = vsub.f32 %v2234_v18, %v1007_v50 }
 0x443   :  { %v2375_v58 = vsub.f32 %v2240_v20, %v1006_v51 }
 0x444   :  { %v1042_v37 = vmul.f32 %v2343_v5, %v2343_v5  ;;  %v1039_v3 = vmul.f32 %v2369_v55, %v2369_v55 }
 0x445   :  { %v1038_v20 = vmul.f32 %v2375_v58, %v2375_v58 }
 0x446   :  { %v1074_v44 = vsel %vm120_vm3, %v1042_v37, 0.0  ;;  %v1065_v47 = vsel %vm120_vm3, %v1039_v3, 0.0 }
 0x447   :  { %1078 = vadd.xlane.f32.xlu2 %v1077_v43  ;;  %753 = vadd.xlane.f32.xlu1 %v752_v19  ;;  %v632_v53 = vpop.xlane.xlu0 %631  ;;  %v962_v62 = vpop.xlane.xlu1 %961  ;;  %v1062_v4 = vsel %vm120_vm3, %v1038_v20, 0.0 }
 0x448   :  { %1075 = vadd.xlane.f32.xlu0 %v1074_v44  ;;  %v965_v60 = vpop.xlane.xlu2 %964  ;;  %v646_v2 = vmul.f32 %v2275_v42, %v632_v53  ;;  %v1004_v6 = vmul.f32 %v962_v62, %v2275_v42  ;;  %v1358_v53 = vld [vmem:[%s2894_s6 + $0x10] sm:$0xff] }
 0x449   :  { %v1005_v18 = vmul.f32 %v965_v60, %v2275_v42 }
 0x44a   :  { %v2391_v11 = vsub.f32 %v2251_v26, %v646_v2  ;;  %v2397_v17 = vsub.f32 %v2254_v27, %v1004_v6 }
 0x44b   :  { %v2388_v9 = vsub.f32 %v2257_v28, %v1005_v18 }
 0x44c   :  { %v652_v22 = vmul.f32 %v2391_v11, %v2391_v11  ;;  %v1036_v23 = vmul.f32 %v2397_v17, %v2397_v17 }
 0x44d   :  { %v1037_v26 = vmul.f32 %v2388_v9, %v2388_v9 }
 0x44e   :  { %v655_v59 = vsel %vm120_vm3, %v652_v22, 0.0  ;;  %v1056_v25 = vsel %vm120_vm3, %v1036_v23, 0.0 }
 0x44f   :  { %1072 = vadd.xlane.f32.xlu2 %v1071_v14  ;;  %756 = vadd.xlane.f32.xlu1 %v755_v56  ;;  %v635_v21 = vpop.xlane.xlu0 %634  ;;  %v1059_v24 = vsel %vm120_vm3, %v1037_v26, 0.0  ;;  %v1357_v14 = vld [vmem:[%s2894_s6 + $0x8] sm:$0xff] }
 0x450   :  { %1069 = vadd.xlane.f32.xlu0 %v1068_v61  ;;  %v647_v28 = vmul.f32 %v2275_v42, %v635_v21  ;;  %v638_v13 = vpop.xlane.xlu2 %637  ;;  %v1356_v61 = vld [vmem:[%s2894_s6] sm:$0xff] }
 0x451   :  { %v648_v29 = vmul.f32 %v2275_v42, %v638_v13 }
 0x452   :  { %v2408_v27 = vsub.f32 %v2266_v32, %v647_v28 }
 0x453   :  { %v2417_v34 = vsub.f32 %v2269_v33, %v648_v29  ;;  %v1359_v33 = vld [vmem:[%s2894_s6 + $0x18] sm:$0xff] }
 0x454   :  { %v653_v30 = vmul.f32 %v2408_v27, %v2408_v27  ;;  %1383 = vmatpush.msrb.mxu0 %v1359_v33 }
 0x455   :  { %v654_v35 = vmul.f32 %v2417_v34, %v2417_v34 }
 0x456   :  { %v658_v32 = vsel %vm120_vm3, %v653_v30, 0.0  ;;  %1384 = vmatpush.msrb.mxu0 %v1358_v53 }
 0x457   :  { %1066 = vadd.xlane.f32.xlu2 %v1065_v47  ;;  %759 = vadd.xlane.f32.xlu1 %v758_v15  ;;  %v661_v36 = vsel %vm120_vm3, %v654_v35, 0.0 }
 0x458   :  { %1063 = vadd.xlane.f32.xlu0 %v1062_v4  ;;  %1385 = vmatpush.msrb.mxu0 %v1357_v14 }
 0x45a   :  { %1386 = vmatpush.msrb.mxu0 %v1356_v61 }
 0x45f   :  { %1060 = vadd.xlane.f32.xlu2 %v1059_v24  ;;  %656 = vadd.xlane.f32.xlu1 %v655_v59 }
 0x460   :  { %1057 = vadd.xlane.f32.xlu0 %v1056_v25 }
 0x467   :  { %659 = vadd.xlane.f32.xlu1 %v658_v32 }
 0x46f   :  { %662 = vadd.xlane.f32.xlu1 %v661_v36 }
 0x49a   :  { %v1091_v37 = vpop.xlane.xlu0 %1090 }
 0x49b   :  { %v1111_v38 = vmul.f32 %v1091_v37, %v2275_v42 }
 0x49d   :  { %v2424_v39 = vadd.f32 1e-05, %v1111_v38 }
 0x49f   :  { %1672 = vrsqrt.f32 %v2424_v39  ;;  %vm1266_vm7 = vweird.f32 %v2424_v39 }
 0x4a2   :  { %v1088_v41 = vpop.xlane.xlu2 %1087  ;;  %v1094_v43 = vpop.xlane.xlu0 %1093 }
 0x4a3   :  { %v1110_v19 = vmul.f32 %v1088_v41, %v2275_v42  ;;  %v1112_v44 = vmul.f32 %v1094_v43, %v2275_v42 }
 0x4a5   :  { %v2432_v50 = vpop.eup %1672  ;;  %v1126_v12 = vadd.f32 1e-05, %v1110_v19  ;;  %v2434_v51 = vadd.f32 1e-05, %v1112_v44 }
 0x4a6   :  { %v1261_v52 = vmul.f32 %v2432_v50, %v2424_v39  ;;  %vm1267_vm8 = vweird.f32 %v2432_v50 }
 0x4a7   :  { %1674 = vrsqrt.f32 %v1126_v12  ;;  %vm2494_vm11 = vmor %vm1266_vm7, %vm1267_vm8  ;;  %vm1256_vm12 = vweird.f32 %v1126_v12  ;;  %vm1276_vm14 = vweird.f32 %v2434_v51 }
 0x4a8   :  { %1676 = vrsqrt.f32 %v2434_v51  ;;  %v1262_v56 = vmul.f32 %v2432_v50, %v1261_v52 }
 0x4aa   :  { %v1097_v57 = vpop.xlane.xlu1 %1096  ;;  %v956_v60 = vpop.xlane.xlu0 %955  ;;  %v1263_v3 = vmul.f32 0.5, %v1262_v56 }
 0x4ab   :  { %v1113_v62 = vmul.f32 %v1097_v57, %v2275_v42  ;;  %v1002_v18 = vmul.f32 %v956_v60, %v2275_v42 }
 0x4ac   :  { %v1264_v26 = vsub.f32 1.5, %v1263_v3 }
 0x4ad   :  { %v2451_v2 = vpop.eup %1674  ;;  %v2453_v6 = vadd.f32 1e-05, %v1113_v62  ;;  %v2456_v20 = vsub.f32 %v2301_v63, %v1002_v18 }
 0x4ae   :  { %v2458_v47 = vpop.eup %1676  ;;  %v1251_v15 = vmul.f32 %v2451_v2, %v1126_v12  ;;  %v1265_v37 = vmul.f32 %v2432_v50, %v1264_v26  ;;  %vm1257_vm9 = vweird.f32 %v2451_v2 }
 0x4af   :  { %v1271_v21 = vmul.f32 %v2458_v47, %v2434_v51  ;;  %1678 = vrsqrt.f32 %v2453_v6  ;;  %v1034_v28 = vmul.f32 %v2456_v20, %v2456_v20  ;;  %vm1277_vm10 = vweird.f32 %v2458_v47  ;;  %vm2499_vm13 = vmor %vm1256_vm12, %vm1257_vm9 }
 0x4b0   :  { %v1252_v4 = vmul.f32 %v2451_v2, %v1251_v15  ;;  %v1269_v39 = vsel %vm2494_vm11, %v2432_v50, %v1265_v37  ;;  %vm2511_vm15 = vmor %vm1276_vm14, %vm1277_vm10  ;;  %vm1286_vm0 = vweird.f32 %v2453_v6 }
 0x4b1   :  { %v1272_v22 = vmul.f32 %v2458_v47, %v1271_v21  ;;  %v1050_v59 = vsel %vm120_vm3, %v1034_v28, 0.0  ;;  %v1303_v28 = vmul.f32 %v1269_v39, %v2279_v45 }
 0x4b2   :  { %v1253_v23 = vmul.f32 0.5, %v1252_v4  ;;  %v959_v63 = vpop.xlane.xlu1 %958  ;;  %v1085_v24 = vpop.xlane.xlu2 %1084  ;;  %1051 = vadd.xlane.f32.xlu0 %v1050_v59 }
 0x4b3   :  { %v1273_v13 = vmul.f32 0.5, %v1272_v22  ;;  %v1003_v25 = vmul.f32 %v959_v63, %v2275_v42  ;;  %v1109_v29 = vmul.f32 %v1085_v24, %v2275_v42  ;;  %v1082_v30 = vpop.xlane.xlu0 %1081 }
 0x4b4   :  { %v1254_v32 = vsub.f32 1.5, %v1253_v23  ;;  %v1108_v35 = vmul.f32 %v1082_v30, %v2275_v42 }
 0x4b5   :  { %v1679_v36 = vpop.eup %1678  ;;  %v1274_v38 = vsub.f32 1.5, %v1273_v13  ;;  %v2476_v41 = vsub.f32 %v2318_v8, %v1003_v25  ;;  %v2478_v43 = vadd.f32 1e-05, %v1109_v29 }
 0x4b6   :  { %v1255_v33 = vmul.f32 %v2451_v2, %v1254_v32  ;;  %v1281_v19 = vmul.f32 %v1679_v36, %v2453_v6  ;;  %v2483_v44 = vadd.f32 1e-05, %v1108_v35  ;;  %vm1287_vm1 = vweird.f32 %v1679_v36 }
 0x4b7   :  { %v1275_v52 = vmul.f32 %v2458_v47, %v1274_v38  ;;  %1680 = vrsqrt.f32 %v2478_v43  ;;  %v1035_v8 = vmul.f32 %v2476_v41, %v2476_v41  ;;  %vm1288_vm2 = vmor %vm1286_vm0, %vm1287_vm1  ;;  %vm1246_vm4 = vweird.f32 %v2478_v43 }
 0x4b8   :  { %v1282_v14 = vmul.f32 %v1679_v36, %v1281_v19  ;;  %1682 = vrsqrt.f32 %v2483_v44  ;;  %v1259_v60 = vsel %vm2499_vm13, %v2451_v2, %v1255_v33  ;;  %vm1236_vm8 = vweird.f32 %v2483_v44 }
 0x4b9   :  { %v1053_v57 = vsel %vm120_vm3, %v1035_v8, 0.0  ;;  %v1279_v51 = vsel %vm2511_vm15, %v2458_v47, %v1275_v52  ;;  %v1302_v26 = vmul.f32 %v1259_v60, %v2290_v54  ;;  %v2529_v47 = vld [vmem:[%s2893_s4 + $0xc7] ss:$0 sm:$0xff] }
 0x4ba   :  { %v1283_v61 = vmul.f32 0.5, %v1282_v14  ;;  %1054 = vadd.xlane.f32.xlu2 %v1053_v57  ;;  %v1079_v62 = vpop.xlane.xlu2 %1078  ;;  %v754_v18 = vpop.xlane.xlu1 %753  ;;  %v1304_v63 = vmul.f32 %v1279_v51, %v2287_v7  ;;  %v1320_v30 = vmul.f32 %v2529_v47, %v1303_v28  ;;  %v2565_v57 = vld [vmem:[%s2893_s4 + $0xc8] ss:$0 sm:$0xff] }
 0x4bb   :  { %v1107_v3 = vmul.f32 %v1079_v62, %v2275_v42  ;;  %v761_v50 = vmul.f32 %v754_v18, %v2275_v42  ;;  %v1076_v15 = vpop.xlane.xlu0 %1075  ;;  %v1319_v38 = vmul.f32 %v2529_v47, %v1302_v26 }
 0x4bc   :  { %v1284_v21 = vsub.f32 1.5, %v1283_v61  ;;  %v1106_v2 = vmul.f32 %v1076_v15, %v2275_v42 }
 0x4bd   :  { %v2522_v4 = vpop.eup %1680  ;;  %v2531_v22 = vadd.f32 1e-05, %v1107_v3  ;;  %v2534_v23 = vsub.f32 %v2339_v31, %v761_v50 }
 0x4be   :  { %v2536_v6 = vpop.eup %1682  ;;  %v1285_v24 = vmul.f32 %v1679_v36, %v1284_v21  ;;  %v1241_v45 = vmul.f32 %v2522_v4, %v2478_v43  ;;  %v2541_v59 = vadd.f32 1e-05, %v1106_v2  ;;  %vm1247_vm5 = vweird.f32 %v2522_v4 }
 0x4bf   :  { %v1231_v54 = vmul.f32 %v2536_v6, %v2483_v44  ;;  %1684 = vrsqrt.f32 %v2531_v22  ;;  %v767_v29 = vmul.f32 %v2534_v23, %v2534_v23  ;;  %vm1237_vm6 = vweird.f32 %v2536_v6  ;;  %vm2587_vm7 = vmor %vm1246_vm4, %vm1247_vm5 }
 0x4c0   :  { %v1289_v13 = vsel %vm1288_vm2, %v1679_v36, %v1285_v24  ;;  %v1242_v31 = vmul.f32 %v2522_v4, %v1241_v45  ;;  %1686 = vrsqrt.f32 %v2541_v59  ;;  %v1321_v36 = vmul.f32 %v2529_v47, %v1304_v63  ;;  %vm2604_vm9 = vmor %vm1236_vm8, %vm1237_vm6 }
 0x4c1   :  { %v1305_v25 = vmul.f32 %v1289_v13, %v2304_v1  ;;  %v1232_v7 = vmul.f32 %v2536_v6, %v1231_v54  ;;  %v770_v14 = vsel %vm120_vm3, %v767_v29, 0.0  ;;  %v1337_v63 = vadd.f32 %v2565_v57, %v1320_v30 }
 0x4c2   :  { %v1243_v32 = vmul.f32 0.5, %v1242_v31  ;;  %v1073_v35 = vpop.xlane.xlu2 %1072  ;;  %v757_v37 = vpop.xlane.xlu1 %756  ;;  %771 = vadd.xlane.f32.xlu1 %v770_v14  ;;  %v1338_v43 = vadd.f32 %v2565_v57, %v1321_v36  ;;  %v2611_v24 = vadd.f32 %v2565_v57, %v1319_v38  ;;  %vm1226_vm11 = vweird.f32 %v2531_v22 }
 0x4c3   :  { %v1322_v33 = vmul.f32 %v2529_v47, %v1305_v25  ;;  %v1233_v19 = vmul.f32 0.5, %v1232_v7  ;;  %v1105_v1 = vmul.f32 %v1073_v35, %v2275_v42  ;;  %v762_v52 = vmul.f32 %v757_v37, %v2275_v42  ;;  %v1070_v8 = vpop.xlane.xlu0 %1069 }
 0x4c4   :  { %v1244_v53 = vsub.f32 1.5, %v1243_v32  ;;  %v1104_v56 = vmul.f32 %v1070_v8, %v2275_v42  ;;  %v1354_v38 = vmax.f32 %v1338_v43, 0.0  ;;  %vm1216_vm12 = vweird.f32 %v2541_v59 }
 0x4c5   :  { %v2567_v39 = vpop.eup %1684  ;;  %v1234_v60 = vsub.f32 1.5, %v1233_v19  ;;  %v2570_v12 = vadd.f32 1e-05, %v1105_v1  ;;  %v2573_v61 = vsub.f32 %v2360_v49, %v762_v52  ;;  %v1339_v50 = vadd.f32 %v2565_v57, %v1322_v33 }
 0x4c6   :  { %v2575_v62 = vpop.eup %1686  ;;  %v1245_v18 = vmul.f32 %v2522_v4, %v1244_v53  ;;  %v1221_v51 = vmul.f32 %v2567_v39, %v2531_v22  ;;  %v2580_v3 = vadd.f32 1e-05, %v1104_v56  ;;  %vm1227_vm10 = vweird.f32 %v2567_v39 }
 0x4c7   :  { %v1235_v49 = vmul.f32 %v2536_v6, %v1234_v60  ;;  %v1211_v21 = vmul.f32 %v2575_v62, %v2541_v59  ;;  %1688 = vrsqrt.f32 %v2570_v12  ;;  %v1355_v54 = vmax.f32 %v1339_v50, 0.0  ;;  %vm2651_vm13 = vmor %vm1226_vm11, %vm1227_vm10 }
 0x4c8   :  { %v1249_v2 = vsel %vm2587_vm7, %v2522_v4, %v1245_v18  ;;  %v1222_v28 = vmul.f32 %v2567_v39, %v1221_v51  ;;  %1690 = vrsqrt.f32 %v2580_v3  ;;  %v768_v31 = vmul.f32 %v2573_v61, %v2573_v61 }
 0x4c9   :  { %v1212_v44 = vmul.f32 %v2575_v62, %v1211_v21  ;;  %v1239_v4 = vsel %vm2604_vm9, %v2536_v6, %v1235_v49  ;;  %v1301_v7 = vmul.f32 %v1249_v2, %v2322_v16  ;;  %1572 = vmatpush.xpose.msk.msra.mxu0 %vm120_vm3, %v1355_v54  ;;  %v1353_v60 = vmax.f32 %v1337_v63, 0.0 }
 0x4ca   :  { %v1223_v45 = vmul.f32 0.5, %v1222_v28  ;;  %v1067_v13 = vpop.xlane.xlu2 %1066  ;;  %v760_v25 = vpop.xlane.xlu1 %759  ;;  %v773_v6 = vsel %vm120_vm3, %v768_v31, 0.0  ;;  %v1300_v19 = vmul.f32 %v1239_v4, %v2313_v10  ;;  %vm1217_vm14 = vweird.f32 %v2575_v62 }
 0x4cb   :  { %v1213_v29 = vmul.f32 0.5, %v1212_v44  ;;  %v1103_v32 = vmul.f32 %v1067_v13, %v2275_v42  ;;  %v763_v30 = vmul.f32 %v760_v25, %v2275_v42  ;;  %v1064_v35 = vpop.xlane.xlu0 %1063  ;;  %774 = vadd.xlane.f32.xlu2 %v773_v6  ;;  %v1318_v18 = vmul.f32 %v2529_v47, %v1301_v7  ;;  %vm2679_vm0 = vmor %vm1216_vm12, %vm1217_vm14 }
 0x4cc   :  { %v1224_v37 = vsub.f32 1.5, %v1223_v45  ;;  %v1102_v36 = vmul.f32 %v1064_v35, %v2275_v42  ;;  %v1352_v22 = vmax.f32 %v2611_v24, 0.0  ;;  %v1317_v15 = vmul.f32 %v2529_v47, %v1300_v19 }
 0x4cd   :  { %v2624_v33 = vpop.eup %1688  ;;  %v1214_v16 = vsub.f32 1.5, %v1213_v29  ;;  %v2628_v1 = vadd.f32 1e-05, %v1103_v32  ;;  %v2636_v14 = vsub.f32 %v2378_v0, %v763_v30  ;;  %1573 = vmatpush.xpose.msk.msra.mxu0 %vm120_vm3, %v1354_v38  ;;  %v1335_v45 = vadd.f32 %v2565_v57, %v1318_v18 }
 0x4ce   :  { %v2630_v52 = vpop.eup %1690  ;;  %v1225_v8 = vmul.f32 %v2567_v39, %v1224_v37  ;;  %v1201_v53 = vmul.f32 %v2624_v33, %v2570_v12  ;;  %v2638_v56 = vadd.f32 1e-05, %v1102_v36  ;;  %vm1207_vm15 = vweird.f32 %v2624_v33 }
 0x4cf   :  { %v1191_v10 = vmul.f32 %v2630_v52, %v2580_v3  ;;  %1692 = vrsqrt.f32 %v2628_v1  ;;  %v1215_v21 = vmul.f32 %v2575_v62, %v1214_v16  ;;  %v769_v26 = vmul.f32 %v2636_v14, %v2636_v14 }
 0x4d0   :  { %v1202_v51 = vmul.f32 %v2624_v33, %v1201_v53  ;;  %1694 = vrsqrt.f32 %v2638_v56  ;;  %v1229_v49 = vsel %vm2651_vm13, %v2567_v39, %v1225_v8  ;;  %vm1206_vm1 = vweird.f32 %v2570_v12 }
 0x4d1   :  { %v1192_v50 = vmul.f32 %v2630_v52, %v1191_v10  ;;  %1574 = vmatpush.xpose.msk.msra.mxu0 %vm120_vm3, %v1353_v60  ;;  %v776_v39 = vsel %vm120_vm3, %v769_v26, 0.0  ;;  %v1299_v25 = vmul.f32 %v1229_v49, %v2332_v48  ;;  %v1219_v48 = vsel %vm2679_vm0, %v2575_v62, %v1215_v21  ;;  %vm2709_vm4 = vmor %vm1206_vm1, %vm1207_vm15 }
 0x4d2   :  { %v1203_v2 = vmul.f32 0.5, %v1202_v51  ;;  %v1061_v28 = vpop.xlane.xlu2 %1060  ;;  %v657_v43 = vpop.xlane.xlu1 %656  ;;  %777 = vadd.xlane.f32.xlu0 %v776_v39  ;;  %vm1197_vm2 = vweird.f32 %v2630_v52  ;;  %v1334_v62 = vadd.f32 %v2565_v57, %v1317_v15  ;;  %v1298_v19 = vmul.f32 %v1219_v48, %v2343_v5 }
 0x4d3   :  { %v1193_v44 = vmul.f32 0.5, %v1192_v50  ;;  %v1101_v63 = vmul.f32 %v1061_v28, %v2275_v42  ;;  %v664_v4 = vmul.f32 %v657_v43, %v2275_v42  ;;  %v1058_v24 = vpop.xlane.xlu0 %1057  ;;  %v1316_v53 = vmul.f32 %v2529_v47, %v1299_v25 }
 0x4d4   :  { %v1204_v54 = vsub.f32 1.5, %v1203_v2  ;;  %v1100_v13 = vmul.f32 %v1058_v24, %v2275_v42  ;;  %v1351_v5 = vmax.f32 %v1335_v45, 0.0  ;;  %vm1196_vm5 = vweird.f32 %v2580_v3 }
 0x4d5   :  { %v2672_v31 = vpop.eup %1692  ;;  %v1194_v29 = vsub.f32 1.5, %v1193_v44  ;;  %v2683_v32 = vadd.f32 1e-05, %v1101_v63  ;;  %v2685_v30 = vadd.f32 1e-05, %v664_v4  ;;  %1575 = vmatpush.xpose.msk.msra.mxu0 %vm120_vm3, %v1352_v22  ;;  %vm2724_vm6 = vmor %vm1196_vm5, %vm1197_vm2  ;;  %v1333_v2 = vadd.f32 %v2565_v57, %v1316_v53 }
 0x4d6   :  { %v2687_v35 = vpop.eup %1694  ;;  %v1205_v37 = vmul.f32 %v2624_v33, %v1204_v54  ;;  %v1181_v59 = vmul.f32 %v2672_v31, %v2628_v1  ;;  %v2695_v6 = vadd.f32 1e-05, %v1100_v13  ;;  %vm1187_vm7 = vweird.f32 %v2672_v31 }
 0x4d7   :  { %v1171_v36 = vmul.f32 %v2687_v35, %v2638_v56  ;;  %1696 = vrsqrt.f32 %v2683_v32  ;;  %v1195_v16 = vmul.f32 %v2630_v52, %v1194_v29  ;;  %v1315_v63 = vmul.f32 %v2529_v47, %v1298_v19 }
 0x4d8   :  { %v1182_v38 = vmul.f32 %v2672_v31, %v1181_v59  ;;  %1698 = vrsqrt.f32 %v2685_v30  ;;  %v1209_v10 = vsel %vm2709_vm4, %v2624_v33, %v1205_v37  ;;  %v1350_v33 = vmax.f32 %v1334_v62, 0.0 }
 0x4d9   :  { %v1172_v8 = vmul.f32 %v2687_v35, %v1171_v36  ;;  %1700 = vrsqrt.f32 %v2695_v6  ;;  %1576 = vmatpush.xpose.msk.msra.mxu0 %vm120_vm3, %v1351_v5  ;;  %v1297_v49 = vmul.f32 %v1209_v10, %v2351_v40  ;;  %v1199_v3 = vsel %vm2724_vm6, %v2630_v52, %v1195_v16 }
 0x4da   :  { %v1183_v60 = vmul.f32 0.5, %v1182_v38  ;;  %v660_v18 = vpop.xlane.xlu1 %659  ;;  %vm1186_vm8 = vweird.f32 %v2628_v1  ;;  %v1296_v4 = vmul.f32 %v1199_v3, %v2358_v46  ;;  %vm1176_vm9 = vweird.f32 %v2638_v56 }
 0x4db   :  { %v1173_v51 = vmul.f32 0.5, %v1172_v8  ;;  %v665_v0 = vmul.f32 %v660_v18, %v2275_v42  ;;  %vm1177_vm10 = vweird.f32 %v2687_v35  ;;  %vm2755_vm11 = vmor %vm1186_vm8, %vm1187_vm7  ;;  %v1349_v39 = vmax.f32 %v1333_v2, 0.0 }
 0x4dc   :  { %v1184_v22 = vsub.f32 1.5, %v1183_v60  ;;  %v1314_v46 = vmul.f32 %v2529_v47, %v1297_v49  ;;  %v1332_v48 = vadd.f32 %v2565_v57, %v1315_v63  ;;  %vm676_vm12 = vweird.f32 %v2685_v30  ;;  %vm2778_vm15 = vmor %vm1176_vm9, %vm1177_vm10 }
 0x4dd   :  { %v2730_v15 = vpop.eup %1696  ;;  %v2736_v21 = vadd.f32 1e-05, %v665_v0  ;;  %v1174_v26 = vsub.f32 1.5, %v1173_v51  ;;  %1577 = vmatpush.xpose.msk.msra.mxu0 %vm120_vm3, %v1350_v33  ;;  %vm1166_vm0 = vweird.f32 %v2683_v32  ;;  %v1621_v0 = vld [vmem:[%s2893_s4 + $0xc1] ss:$0 sm:$0xff]  ;;  %vm1156_vm5 = vweird.f32 %v2695_v6 }
 0x4de   :  { %v1699_v28 = vpop.eup %1698  ;;  %v1185_v43 = vmul.f32 %v2672_v31, %v1184_v22  ;;  %v1161_v44 = vmul.f32 %v2730_v15, %v2683_v32  ;;  %vm1167_vm13 = vweird.f32 %v2730_v15  ;;  %v1348_v5 = vmax.f32 %v1332_v48, 0.0 }
 0x4df   :  { %v671_v40 = vmul.f32 %v1699_v28, %v2685_v30  ;;  %1702 = vrsqrt.f32 %v2736_v21  ;;  %v2746_v52 = vpop.eup %1700  ;;  %v1175_v25 = vmul.f32 %v2687_v35, %v1174_v26  ;;  %vm677_vm14 = vweird.f32 %v1699_v28  ;;  %vm2804_vm2 = vmor %vm1166_vm0, %vm1167_vm13 }
 0x4e0   :  { %v1162_v24 = vmul.f32 %v2730_v15, %v1161_v44  ;;  %v1151_v54 = vmul.f32 %v2746_v52, %v2695_v6  ;;  %v1189_v13 = vsel %vm2755_vm11, %v2672_v31, %v1185_v43  ;;  %v1313_v31 = vmul.f32 %v2529_v47, %v1296_v4  ;;  %vm678_vm1 = vmor %vm676_vm12, %vm677_vm14  ;;  %v1622_v43 = vld [vmem:[%s2893_s4 + $0xc2] ss:$0 sm:$0xff] }
 0x4e1   :  { %v672_v45 = vmul.f32 %v1699_v28, %v671_v40  ;;  %1578 = vmatpush.xpose.msk.msra.mxu0 %vm120_vm3, %v1349_v39  ;;  %v1295_v19 = vmul.f32 %v1189_v13, %v2369_v55  ;;  %v1179_v10 = vsel %vm2778_vm15, %v2687_v35, %v1175_v25  ;;  %v1331_v55 = vadd.f32 %v2565_v57, %v1314_v46 }
 0x4e2   :  { %v1163_v7 = vmul.f32 0.5, %v1162_v24  ;;  %v663_v29 = vpop.xlane.xlu1 %662  ;;  %v1152_v59 = vmul.f32 %v2746_v52, %v1151_v54  ;;  %v1294_v50 = vmul.f32 %v1179_v10, %v2375_v58  ;;  %v1330_v33 = vadd.f32 %v2565_v57, %v1313_v31 }
 0x4e3   :  { %v673_v37 = vmul.f32 0.5, %v672_v45  ;;  %v666_v36 = vmul.f32 %v663_v29, %v2275_v42  ;;  %v1312_v49 = vmul.f32 %v2529_v47, %v1295_v19  ;;  %v1347_v2 = vmax.f32 %v1331_v55, 0.0 }
 0x4e4   :  { %v1164_v38 = vsub.f32 1.5, %v1163_v7  ;;  %v1153_v8 = vmul.f32 0.5, %v1152_v59  ;;  %vm1157_vm4 = vweird.f32 %v2746_v52  ;;  %vm686_vm7 = vweird.f32 %v2736_v21 }
 0x4e5   :  { %v1703_v62 = vpop.eup %1702  ;;  %v674_v16 = vsub.f32 1.5, %v673_v37  ;;  %v2782_v53 = vadd.f32 1e-05, %v666_v36  ;;  %1579 = vmatpush.xpose.msk.msra.mxu0 %vm120_vm3, %v1348_v5  ;;  %v1346_v63 = vmax.f32 %v1330_v33, 0.0  ;;  %v1329_v40 = vadd.f32 %v2565_v57, %v1312_v49  ;;  %vm1158_vm8 = vmor %vm1156_vm5, %vm1157_vm4 }
 0x4e6   :  { %v681_v60 = vmul.f32 %v1703_v62, %v2736_v21  ;;  %v1165_v18 = vmul.f32 %v2730_v15, %v1164_v38  ;;  %v1154_v51 = vsub.f32 1.5, %v1153_v8  ;;  %vm687_vm6 = vweird.f32 %v1703_v62 }
 0x4e7   :  { %v675_v56 = vmul.f32 %v1699_v28, %v674_v16  ;;  %1704 = vrsqrt.f32 %v2782_v53  ;;  %v1311_v4 = vmul.f32 %v2529_v47, %v1294_v50  ;;  %vm688_vm9 = vmor %vm686_vm7, %vm687_vm6  ;;  %v1345_v46 = vmax.f32 %v1329_v40, 0.0 }
 0x4e8   :  { %v682_v35 = vmul.f32 %v1703_v62, %v681_v60  ;;  %v1169_v58 = vsel %vm2804_vm2, %v2730_v15, %v1165_v18  ;;  %vm696_vm11 = vweird.f32 %v2782_v53 }
 0x4e9   :  { %v679_v22 = vsel %vm678_vm1, %v1699_v28, %v675_v56  ;;  %v1155_v28 = vmul.f32 %v2746_v52, %v1154_v51  ;;  %1580 = vmatpush.xpose.msk.msra.mxu0 %vm120_vm3, %v1347_v2  ;;  %v1293_v15 = vmul.f32 %v1169_v58, %v2388_v9  ;;  %v1328_v9 = vadd.f32 %v2565_v57, %v1311_v4 }
 0x4ea   :  { %v700_v3 = vmul.f32 %v679_v22, %v2391_v11  ;;  %v683_v30 = vmul.f32 0.5, %v682_v35 }
 0x4eb   :  { %v1159_v6 = vsel %vm1158_vm8, %v2746_v52, %v1155_v28  ;;  %v1310_v29 = vmul.f32 %v2529_v47, %v1293_v15  ;;  %v1344_v36 = vmax.f32 %v1328_v9, 0.0 }
 0x4ec   :  { %v704_v26 = vmul.f32 %v1621_v0, %v700_v3  ;;  %v684_v44 = vsub.f32 1.5, %v683_v30  ;;  %v1292_v25 = vmul.f32 %v1159_v6, %v2397_v17 }
 0x4ed   :  { %v1705_v11 = vpop.eup %1704  ;;  %1581 = vmatpush.xpose.msk.msra.mxu0 %vm120_vm3, %v1346_v63 }
 0x4ee   :  { %v685_v24 = vmul.f32 %v1703_v62, %v684_v44  ;;  %v691_v1 = vmul.f32 %v1705_v11, %v2782_v53  ;;  %v708_v45 = vadd.f32 %v1622_v43, %v704_v26  ;;  %vm697_vm10 = vweird.f32 %v1705_v11 }
 0x4ef   :  { %v1309_v17 = vmul.f32 %v2529_v47, %v1292_v25  ;;  %vm698_vm12 = vmor %vm696_vm11, %vm697_vm10 }
 0x4f0   :  { %v689_v54 = vsel %vm688_vm9, %v1703_v62, %v685_v24  ;;  %v692_v39 = vmul.f32 %v1705_v11, %v691_v1  ;;  %v711_v21 = vmax.f32 %v708_v45, 0.0 }
 0x4f1   :  { %v701_v13 = vmul.f32 %v689_v54, %v2408_v27  ;;  %1582 = vmatpush.xpose.msk.msra.mxu0 %vm120_vm3, %v1345_v46  ;;  %v1327_v27 = vadd.f32 %v2565_v57, %v1310_v29  ;;  %v1326_v12 = vadd.f32 %v2565_v57, %v1309_v17 }
 0x4f2   :  { %v693_v7 = vmul.f32 0.5, %v692_v39  ;;  %1569 = vmatmul.msk.f32.vlgmr.msrb.gmra.mxu0 %vm120_vm3, %v711_v21 }
 0x4f3   :  { %v705_v48 = vmul.f32 %v1621_v0, %v701_v13  ;;  %v1343_v19 = vmax.f32 %v1327_v27, 0.0  ;;  %v1342_v53 = vmax.f32 %v1326_v12, 0.0 }
 0x4f4   :  { %v694_v52 = vsub.f32 1.5, %v693_v7 }
 0x4f5   :  { %v709_v37 = vadd.f32 %v1622_v43, %v705_v48  ;;  %1583 = vmatpush.xpose.msk.msra.mxu0 %vm120_vm3, %v1344_v36 }
 0x4f6   :  { %v695_v59 = vmul.f32 %v1705_v11, %v694_v52 }
 0x4f7   :  { %v712_v38 = vmax.f32 %v709_v37, 0.0 }
 0x4f8   :  { %v699_v31 = vsel %vm698_vm12, %v1705_v11, %v695_v59 }
 0x4f9   :  { %v702_v62 = vmul.f32 %v699_v31, %v2417_v34  ;;  %1584 = vmatpush.xpose.msk.msra.mxu0 %vm120_vm3, %v1343_v19 }
 0x4fa   :  { %1570 = vmatmul.msk.f32.gmra.mxu0 %vm120_vm3, %v712_v38 }
 0x4fb   :  { %v706_v16 = vmul.f32 %v1621_v0, %v702_v62 }
 0x4fd   :  { %v710_v8 = vadd.f32 %v1622_v43, %v706_v16  ;;  %1585 = vmatpush.xpose.msk.msra.mxu0 %vm120_vm3, %v1342_v53 }
 0x4ff   :  { %v713_v10 = vmax.f32 %v710_v8, 0.0 }
 0x502   :  { %1571 = vmatmul.msk.f32.gmra.mxu0 %vm120_vm3, %v713_v10 }
 0x525   :  { %v1052_v60 = vpop.xlane.xlu0 %1051 }
 0x526   :  { %v1098_v5 = vmul.f32 %v1052_v60, %v2275_v42 }
 0x528   :  { %v1114_v55 = vadd.f32 1e-05, %v1098_v5 }
 0x52a   :  { %1706 = vrsqrt.f32 %v1114_v55  ;;  %vm1136_vm14 = vweird.f32 %v1114_v55 }
 0x52d   :  { %v1055_v34 = vpop.xlane.xlu2 %1054 }
 0x52e   :  { %v1099_v18 = vmul.f32 %v1055_v34, %v2275_v42 }
 0x530   :  { %v1115_v56 = vadd.f32 1e-05, %v1099_v18  ;;  %v1707_v51 = vpop.eup %1706 }
 0x531   :  { %v1131_v0 = vmul.f32 %v1707_v51, %v1114_v55  ;;  %vm1137_vm13 = vweird.f32 %v1707_v51 }
 0x532   :  { %1708 = vrsqrt.f32 %v1115_v56  ;;  %vm1138_vm15 = vmor %vm1136_vm14, %vm1137_vm13  ;;  %vm1146_vm1 = vweird.f32 %v1115_v56 }
 0x533   :  { %v1132_v35 = vmul.f32 %v1707_v51, %v1131_v0 }
 0x535   :  { %v1133_v50 = vmul.f32 0.5, %v1132_v35  ;;  %v772_v49 = vpop.xlane.xlu1 %771 }
 0x536   :  { %v779_v3 = vmul.f32 %v772_v49, %v2275_v42 }
 0x537   :  { %v1134_v33 = vsub.f32 1.5, %v1133_v50 }
 0x538   :  { %v1709_v22 = vpop.eup %1708  ;;  %v782_v43 = vadd.f32 1e-05, %v779_v3 }
 0x539   :  { %v1141_v32 = vmul.f32 %v1709_v22, %v1115_v56  ;;  %v1135_v30 = vmul.f32 %v1707_v51, %v1134_v33  ;;  %vm1147_vm0 = vweird.f32 %v1709_v22 }
 0x53a   :  { %1710 = vrsqrt.f32 %v782_v43  ;;  %vm1148_vm2 = vmor %vm1146_vm1, %vm1147_vm0  ;;  %vm791_vm5 = vweird.f32 %v782_v43 }
 0x53b   :  { %v1142_v2 = vmul.f32 %v1709_v22, %v1141_v32  ;;  %v1139_v28 = vsel %vm1138_vm15, %v1707_v51, %v1135_v30 }
 0x53c   :  { %v1290_v40 = vmul.f32 %v1139_v28, %v2456_v20 }
 0x53d   :  { %v1143_v58 = vmul.f32 0.5, %v1142_v2 }
 0x53e   :  { %v775_v44 = vpop.xlane.xlu2 %774  ;;  %v1307_v39 = vmul.f32 %v2529_v47, %v1290_v40 }
 0x53f   :  { %v1144_v26 = vsub.f32 1.5, %v1143_v58  ;;  %v780_v63 = vmul.f32 %v775_v44, %v2275_v42 }
 0x540   :  { %v1711_v4 = vpop.eup %1710  ;;  %v1324_v9 = vadd.f32 %v2565_v57, %v1307_v39 }
 0x541   :  { %v1145_v11 = vmul.f32 %v1709_v22, %v1144_v26  ;;  %v783_v24 = vadd.f32 1e-05, %v780_v63  ;;  %v786_v45 = vmul.f32 %v1711_v4, %v782_v43  ;;  %vm792_vm4 = vweird.f32 %v1711_v4 }
 0x542   :  { %vm793_vm6 = vmor %vm791_vm5, %vm792_vm4  ;;  %v1340_v59 = vmax.f32 %v1324_v9, 0.0 }
 0x543   :  { %v1149_v15 = vsel %vm1148_vm2, %v1709_v22, %v1145_v11  ;;  %1712 = vrsqrt.f32 %v783_v24  ;;  %v787_v6 = vmul.f32 %v1711_v4, %v786_v45  ;;  %vm801_vm8 = vweird.f32 %v783_v24 }
 0x544   :  { %v1291_v1 = vmul.f32 %v1149_v15, %v2476_v41 }
 0x545   :  { %v788_v21 = vmul.f32 0.5, %v787_v6  ;;  %v778_v46 = vpop.xlane.xlu0 %777 }
 0x546   :  { %v1308_v54 = vmul.f32 %v2529_v47, %v1291_v1  ;;  %v781_v25 = vmul.f32 %v778_v46, %v2275_v42  ;;  %v1623_v47 = vld [vmem:[%s2893_s4 + $0xc4] ss:$0 sm:$0xff] }
 0x547   :  { %v789_v20 = vsub.f32 1.5, %v788_v21 }
 0x548   :  { %v1325_v13 = vadd.f32 %v2565_v57, %v1308_v54  ;;  %v784_v41 = vadd.f32 1e-05, %v781_v25  ;;  %v1624_v57 = vld [vmem:[%s2893_s4 + $0xc5] ss:$0 sm:$0xff] }
 0x549   :  { %v1713_v29 = vpop.eup %1712  ;;  %v790_v48 = vmul.f32 %v1711_v4, %v789_v20 }
 0x54a   :  { %v1341_v7 = vmax.f32 %v1325_v13, 0.0  ;;  %v796_v52 = vmul.f32 %v1713_v29, %v783_v24  ;;  %1714 = vrsqrt.f32 %v784_v41  ;;  %vm802_vm7 = vweird.f32 %v1713_v29 }
 0x54b   :  { %v794_v37 = vsel %vm793_vm6, %v1711_v4, %v790_v48  ;;  %vm803_vm9 = vmor %vm801_vm8, %vm802_vm7  ;;  %vm811_vm11 = vweird.f32 %v784_v41 }
 0x54c   :  { %1586 = vmatpush.xpose.msk.msra.mxu0 %vm120_vm3, %v1341_v7  ;;  %v797_v42 = vmul.f32 %v1713_v29, %v796_v52  ;;  %v815_v36 = vmul.f32 %v794_v37, %v2534_v23 }
 0x54e   :  { %v798_v27 = vmul.f32 0.5, %v797_v42  ;;  %v819_v17 = vmul.f32 %v1623_v47, %v815_v36 }
 0x550   :  { %1587 = vmatpush.xpose.msk.msra.mxu0 %vm120_vm3, %v1340_v59  ;;  %v799_v38 = vsub.f32 1.5, %v798_v27  ;;  %v1715_v31 = vpop.eup %1714  ;;  %v823_v62 = vadd.f32 %v1624_v57, %v819_v17 }
 0x551   :  { %v806_v12 = vmul.f32 %v1715_v31, %v784_v41  ;;  %vm812_vm10 = vweird.f32 %v1715_v31 }
 0x552   :  { %v800_v19 = vmul.f32 %v1713_v29, %v799_v38  ;;  %v826_v16 = vmax.f32 %v823_v62, 0.0  ;;  %vm813_vm12 = vmor %vm811_vm11, %vm812_vm10 }
 0x553   :  { %v807_v53 = vmul.f32 %v1715_v31, %v806_v12 }
 0x554   :  { %v804_v8 = vsel %vm803_vm9, %v1713_v29, %v800_v19  ;;  %1588 = vmatmul.msk.f32.vlgmr.msra.gmra.mxu0 %vm120_vm3, %v826_v16 }
 0x555   :  { %v816_v23 = vmul.f32 %v804_v8, %v2573_v61  ;;  %v808_v10 = vmul.f32 0.5, %v807_v53  ;;  %v1625_v61 = vld [vmem:[%s2894_s6 + $0x20] ss:$0 sm:$0xff] }
 0x557   :  { %v820_v60 = vmul.f32 %v1623_v47, %v816_v23  ;;  %v809_v5 = vsub.f32 1.5, %v808_v10 }
 0x559   :  { %v824_v55 = vadd.f32 %v1624_v57, %v820_v60  ;;  %v810_v34 = vmul.f32 %v1715_v31, %v809_v5 }
 0x55b   :  { %v827_v18 = vmax.f32 %v824_v55, 0.0  ;;  %v814_v56 = vsel %vm813_vm12, %v1715_v31, %v810_v34 }
 0x55c   :  { %v817_v51 = vmul.f32 %v814_v56, %v2636_v14 }
 0x55d   :  { %1589 = vmatmul.msk.f32.gmra.mxu0 %vm120_vm3, %v827_v18 }
 0x55e   :  { %v821_v0 = vmul.f32 %v1623_v47, %v817_v51 }
 0x560   :  { %v825_v35 = vadd.f32 %v1624_v57, %v821_v0 }
 0x562   :  { %v828_v50 = vmax.f32 %v825_v35, 0.0 }
 0x565   :  { %1590 = vmatmul.msk.f32.gmra.mxu0 %vm120_vm3, %v828_v50 }
 0x56f   :  { %v1388_v22 = vpop.f32.mrf.mxu0 }
 0x570   :  { %v1389_v33 = vadd.f32 %v1625_v61, %v1388_v22 }
 0x572   :  { %1397 = vst [vmem:[%s2895_s7] sm:$0xff] %v1389_v33 }
 0x577   :  { %v1391_v49 = vpop.f32.mrf.mxu0 }
 0x578   :  { %v1392_v32 = vadd.f32 %v1625_v61, %v1391_v49 }
 0x57a   :  { %1398 = vst [vmem:[%s2895_s7 + $0x8] sm:$0xff] %v1392_v32 }
 0x57f   :  { %v1394_v14 = vpop.f32.mrf.mxu0 }
 0x580   :  { %v1395_v3 = vadd.f32 %v1625_v61, %v1394_v14 }
 0x582   :  { %1399 = vst [vmem:[%s2895_s7 + $0x10] sm:$0xff] %v1395_v3 }
 0x5d1   :  { %v1474_v30 = vpop.f32.mrf.mxu0 }
 0x5d2   :  { %1483 = vst [vmem:[%s2896_s8] sm:$0xff] %v1474_v30 }
 0x5da   :  { %v1477_v2 = vpop.f32.mrf.mxu0 }
 0x5db   :  { %1484 = vst [vmem:[%s2896_s8 + $0x8] sm:$0xff] %v1477_v2 }
 0x5e2   :  { %v1480_v43 = vpop.f32.mrf.mxu0 }
 0x5e3   :  { %1485 = vst [vmem:[%s2896_s8 + $0x10] sm:$0xff] %v1480_v43 }

</bundles_post_ra>
